<compile_context>
chip_gen: v6e
topology: v6e:2x2x1
jax: 0.10.0
libtpu: 0.0.40
codegen_flags: <defaults>
</compile_context>

<pallas_src>
import math
import numpy as np
import jax
import jax.numpy as jnp
from jax import lax
from jax.experimental import pallas as pl
from jax.experimental.pallas import tpu as pltpu

# ---------------- small, self-consistent config (scaled-down SmolLM2) ----------------
HIDDEN = 64
INTERMEDIATE = 128
N_LAYERS = 2
N_HEADS = 4
N_KV_HEADS = 2
HEAD_DIM = HIDDEN // N_HEADS            # 16
KV_GROUPS = N_HEADS // N_KV_HEADS       # 2
KV_DIM = N_KV_HEADS * HEAD_DIM          # 32
QK_DIM = HIDDEN + KV_DIM                # 96   (q | k)
QKV_DIM = HIDDEN + 2 * KV_DIM           # 128  (q | k | v)  -> dense MXU lanes
GU_DIM = 2 * INTERMEDIATE               # 256  (gate | up)  -> dense MXU lanes
VOCAB = 256
EPS = 1e-5
ROPE_THETA = 10000.0
INIT_STD = 0.041666666666666664

BATCH = 2
SEQ = 8
BS = BATCH * SEQ


# ---------------------------- in-kernel helpers ----------------------------
def _rmsnorm(x):
    # Gain-free RMSNorm: the per-feature gain is folded into the rows of the following
    # projection weight at pack time (exact reordering; bitwise identical for gain=1).
    return x * lax.rsqrt(jnp.mean(x * x, axis=-1, keepdims=True) + EPS)


# ---------------------------- fused full-forward kernel ----------------------------
def fused_forward_kernel(emb_ref, cos_ref, sin_ref, rot_ref,
                         wqkv_ref, woh_ref, wgu_ref, wd_ref, wout_ref, out_ref):
    # One grid step == one batch element (grid axis is "parallel").
    h = emb_ref[...]                                    # (S, H) residual stream, in registers
    cosf = cos_ref[...]                                 # (S, 128), ones on the v columns
    sinf = sin_ref[...]                                 # (S, 128), zeros on the v columns
    rotf = rot_ref[...]                                 # (128, 128) block-diag rotate-half
    scale = 1.0 / math.sqrt(HEAD_DIM)

    for l in range(N_LAYERS):                           # static, fully unrolled layer loop
        # ---------------- attention block ----------------
        xn = _rmsnorm(h)                                # ln1 gain folded into Wqkv rows
        qkv = jnp.dot(xn, wqkv_ref[l],
                      preferred_element_type=jnp.float32)            # (S,128)=[q0..q3|k0 k1|v0 v1]
        # RoPE on the whole fused slab (identity on the v columns):
        #   rope(x) = x * cos + (x @ R) * sin
        qkv = qkv * cosf + jnp.dot(qkv, rotf,
                                   preferred_element_type=jnp.float32) * sinf

        # Head-batched tensors (N_HEADS, S, HEAD_DIM); GQA repeat = reuse the kv slice.
        q_h = jnp.stack([qkv[:, i * HEAD_DIM:(i + 1) * HEAD_DIM]
                         for i in range(N_HEADS)], axis=0)
        k_h = jnp.stack([qkv[:, (N_HEADS + i // KV_GROUPS) * HEAD_DIM:
                               (N_HEADS + i // KV_GROUPS + 1) * HEAD_DIM]
                         for i in range(N_HEADS)], axis=0)
        v_h = jnp.stack([qkv[:, (N_HEADS + N_KV_HEADS + i // KV_GROUPS) * HEAD_DIM:
                               (N_HEADS + N_KV_HEADS + i // KV_GROUPS + 1) * HEAD_DIM]
                         for i in range(N_HEADS)], axis=0)

        # Single batched dot_general pair over all heads (no per-head loop, no lane concat).
        s = lax.dot_general(q_h, k_h, (((2,), (2,)), ((0,), (0,))),
                            preferred_element_type=jnp.float32) * scale      # (NH, S, S)
        s = s - jnp.max(s, axis=-1, keepdims=True)      # no attention mask (mask is None)
        p = jnp.exp(s)
        p = p * pl.reciprocal(jnp.sum(p, axis=-1, keepdims=True), approx=True)
        ctx = lax.dot_general(p, v_h, (((2,), (1,)), ((0,), (0,))),
                              preferred_element_type=jnp.float32)            # (NH, S, HD)

        # Head merge folded into the o-projection: head-batched (HD->H) matmul + major-axis sum.
        o = lax.dot_general(ctx, woh_ref[l], (((2,), (1,)), ((0,), (0,))),
                            preferred_element_type=jnp.float32)              # (NH, S, H)
        h = h + jnp.sum(o, axis=0)

        # ---------------- SwiGLU MLP block ----------------
        xn2 = _rmsnorm(h)                               # ln2 gain folded into Wgu rows
        gu = jnp.dot(xn2, wgu_ref[l], preferred_element_type=jnp.float32)    # (S, 256)
        gate = gu[:, :INTERMEDIATE]
        up = gu[:, INTERMEDIATE:]
        act = gate * jax.nn.sigmoid(gate) * up          # SiLU(gate) * up
        h = h + jnp.dot(act, wd_ref[l], preferred_element_type=jnp.float32)

    # ------------- final norm (gain folded into lm_head) + tied lm_head -------------
    xf = _rmsnorm(h)
    out_ref[...] = jnp.dot(xf, wout_ref[...], preferred_element_type=jnp.float32)  # (S, 256)


# ---------------------------- wrapper-side constant tables ----------------------------
def _rope_tables():
    inv_freq = 1.0 / (ROPE_THETA ** (jnp.arange(0, HEAD_DIM, 2, dtype=jnp.float32) / HEAD_DIM))
    pos = jnp.arange(SEQ, dtype=jnp.float32)
    freqs = pos[:, None] * inv_freq[None, :]                  # (S, HD/2)
    cos, sin = jnp.cos(freqs), jnp.sin(freqs)
    n_rot = QK_DIM // HEAD_DIM                                # 6 groups = 4 q heads + 2 kv heads
    cos_qk = jnp.tile(cos, (1, 2 * n_rot))                    # per 16-lane head group: [c0..c7,c0..c7]
    sin_qk = jnp.tile(sin, (1, 2 * n_rot))
    cos_full = jnp.concatenate([cos_qk, jnp.ones((SEQ, 2 * KV_DIM - KV_DIM), jnp.float32)
                                if False else jnp.ones((SEQ, KV_DIM), jnp.float32)], axis=1)
    sin_full = jnp.concatenate([sin_qk, jnp.zeros((SEQ, KV_DIM), jnp.float32)], axis=1)
    return cos_full, sin_full                                  # (S, 128) each


def _rotate_half_matrix():
    # (128, 128): per 16-wide q/k head group, (x @ R)[:half] = -x[half:], (x @ R)[half:] = x[:half];
    # the trailing 32 v columns/rows are zero so RoPE is the identity on v.
    half = HEAD_DIM // 2
    n_rot = QK_DIM // HEAD_DIM
    R = np.zeros((QKV_DIM, QKV_DIM), np.float32)
    for g in range(n_rot):
        base = g * HEAD_DIM
        for j in range(half):
            R[base + half + j, base + j] = -1.0
            R[base + j, base + half + j] = 1.0
    return jnp.asarray(R)


def _pack_params(params):
    layers = params["layers"]
    # Fold RMSNorm gains into the following projections:  rms(x,w) @ W == rms0(x) @ (diag(w) W)
    wqkv = jnp.stack([lp["ln1"][:, None] *
                      jnp.concatenate([lp["wq"], lp["wk"], lp["wv"]], axis=1)
                      for lp in layers])                                         # (L, H, 128)
    wo_h = jnp.stack([lp["wo"].reshape(N_HEADS, HEAD_DIM, HIDDEN)
                      for lp in layers])                                         # (L, NH, HD, H)
    wgu = jnp.stack([lp["ln2"][:, None] *
                     jnp.concatenate([lp["wg"], lp["wu"]], axis=1)
                     for lp in layers])                                          # (L, H, 256)
    wd = jnp.stack([lp["wd"] for lp in layers])                                  # (L, I, H)
    wout = params["final_norm"][:, None] * params["embed"].T                     # (H, V) tied lm_head
    return wqkv, wo_h, wgu, wd, wout


# ---------------------------- forward (single pallas_call) ----------------------------
def llama_forward(input_ids, params):
    hidden = params["embed"][input_ids].reshape(BS, HIDDEN)   # embedding gather (wrapper glue)
    cos_full, sin_full = _rope_tables()
    rot_full = _rotate_half_matrix()
    wqkv, wo_h, wgu, wd, wout = _pack_params(params)

    logits = pl.pallas_call(
        fused_forward_kernel,
        out_shape=jax.ShapeDtypeStruct((BS, VOCAB), jnp.float32),
        grid_spec=pltpu.PrefetchScalarGridSpec(
            num_scalar_prefetch=0,
            grid=(BATCH,),                                                    # parallel batch axis
            in_specs=[
                pl.BlockSpec((SEQ, HIDDEN), lambda b: (b, 0)),                # embeddings (per batch)
                pl.BlockSpec((SEQ, QKV_DIM), lambda b: (0, 0)),               # cos table (padded)
                pl.BlockSpec((SEQ, QKV_DIM), lambda b: (0, 0)),               # sin table (padded)
                pl.BlockSpec((QKV_DIM, QKV_DIM), lambda b: (0, 0)),           # rotate-half R
                pl.BlockSpec((N_LAYERS, HIDDEN, QKV_DIM), lambda b: (0, 0, 0)),        # fused Wqkv
                pl.BlockSpec((N_LAYERS, N_HEADS, HEAD_DIM, HIDDEN),
                             lambda b: (0, 0, 0, 0)),                                  # Wo per head
                pl.BlockSpec((N_LAYERS, HIDDEN, GU_DIM), lambda b: (0, 0, 0)),         # fused Wgate|up
                pl.BlockSpec((N_LAYERS, INTERMEDIATE, HIDDEN), lambda b: (0, 0, 0)),   # Wdown
                pl.BlockSpec((HIDDEN, VOCAB), lambda b: (0, 0)),              # lm_head (tied, folded)
            ],
            out_specs=pl.BlockSpec((SEQ, VOCAB), lambda b: (b, 0)),
        ),
        compiler_params=pltpu.CompilerParams(dimension_semantics=("parallel",)),
    )(hidden, cos_full, sin_full, rot_full, wqkv, wo_h, wgu, wd, wout)

    return logits.reshape(BATCH, SEQ, VOCAB)


# ---------------------------- params ----------------------------
def init_params(key):
    keys = jax.random.split(key, 1 + N_LAYERS)
    params = {
        "embed": INIT_STD * jax.random.normal(keys[0], (VOCAB, HIDDEN), jnp.float32),
        "final_norm": jnp.ones((HIDDEN,), jnp.float32),
        "layers": [],
    }
    for i in range(N_LAYERS):
        lk = jax.random.split(keys[1 + i], 7)
        params["layers"].append({
            "ln1": jnp.ones((HIDDEN,), jnp.float32),
            "ln2": jnp.ones((HIDDEN,), jnp.float32),
            "wq": INIT_STD * jax.random.normal(lk[0], (HIDDEN, HIDDEN), jnp.float32),
            "wk": INIT_STD * jax.random.normal(lk[1], (HIDDEN, KV_DIM), jnp.float32),
            "wv": INIT_STD * jax.random.normal(lk[2], (HIDDEN, KV_DIM), jnp.float32),
            "wo": INIT_STD * jax.random.normal(lk[3], (HIDDEN, HIDDEN), jnp.float32),
            "wg": INIT_STD * jax.random.normal(lk[4], (HIDDEN, INTERMEDIATE), jnp.float32),
            "wu": INIT_STD * jax.random.normal(lk[5], (HIDDEN, INTERMEDIATE), jnp.float32),
            "wd": INIT_STD * jax.random.normal(lk[6], (INTERMEDIATE, HIDDEN), jnp.float32),
        })
    return params


# ---------------------------- pure-JAX reference ----------------------------
def reference_forward(input_ids, params):
    P = jax.lax.Precision.HIGHEST

    def rms(x, w):
        var = jnp.mean(x * x, axis=-1, keepdims=True)
        return x * jax.lax.rsqrt(var + EPS) * w

    inv_freq = 1.0 / (ROPE_THETA ** (jnp.arange(0, HEAD_DIM, 2, dtype=jnp.float32) / HEAD_DIM))
    pos = jnp.arange(SEQ, dtype=jnp.float32)
    freqs = pos[:, None] * inv_freq[None, :]
    sin, cos = jnp.sin(freqs), jnp.cos(freqs)
    half = HEAD_DIM // 2

    def rope_apply(x):   # (..., S, hd)
        x1, x2 = x[..., :half], x[..., half:]
        return jnp.concatenate([x1 * cos - x2 * sin, x1 * sin + x2 * cos], axis=-1)

    h = params["embed"][input_ids]
    for lp in params["layers"]:
        xn = rms(h, lp["ln1"])
        q = jnp.einsum("bsh,ho->bso", xn, lp["wq"], precision=P)
        k = jnp.einsum("bsh,ho->bso", xn, lp["wk"], precision=P)
        v = jnp.einsum("bsh,ho->bso", xn, lp["wv"], precision=P)
        q = q.reshape(BATCH, SEQ, N_HEADS, HEAD_DIM).transpose(0, 2, 1, 3)
        k = k.reshape(BATCH, SEQ, N_KV_HEADS, HEAD_DIM).transpose(0, 2, 1, 3)
        v = v.reshape(BATCH, SEQ, N_KV_HEADS, HEAD_DIM).transpose(0, 2, 1, 3)
        k = jnp.repeat(k, KV_GROUPS, axis=1)
        v = jnp.repeat(v, KV_GROUPS, axis=1)
        q, k = rope_apply(q), rope_apply(k)
        scores = jnp.einsum("bhqd,bhkd->bhqk", q, k, precision=P) / math.sqrt(HEAD_DIM)
        probs = jax.nn.softmax(scores, axis=-1)            # no mask: attention_mask is None
        ctx = jnp.einsum("bhqk,bhkd->bhqd", probs, v, precision=P)
        ctx = ctx.transpose(0, 2, 1, 3).reshape(BATCH, SEQ, HIDDEN)
        h = h + jnp.einsum("bsh,ho->bso", ctx, lp["wo"], precision=P)
        xn2 = rms(h, lp["ln2"])
        g = jnp.einsum("bsh,hi->bsi", xn2, lp["wg"], precision=P)
        u = jnp.einsum("bsh,hi->bsi", xn2, lp["wu"], precision=P)
        h = h + jnp.einsum("bsi,ih->bsh", jax.nn.silu(g) * u, lp["wd"], precision=P)
    h = rms(h, params["final_norm"])
    return jnp.einsum("bsh,vh->bsv", h, params["embed"], precision=P)


if __name__ == "__main__":
    key = jax.random.PRNGKey(0)
    pkey, dkey = jax.random.split(key)
    params = init_params(pkey)
    input_ids = jax.random.randint(dkey, (BATCH, SEQ), 0, VOCAB, dtype=jnp.int32)

    logits = jax.block_until_ready(llama_forward(input_ids, params))
    ref = jax.block_until_ready(reference_forward(input_ids, params))

    assert logits.shape == (BATCH, SEQ, VOCAB)
    assert np.all(np.isfinite(np.asarray(logits)))
    np.testing.assert_allclose(np.asarray(logits), np.asarray(ref), rtol=5e-3, atol=5e-3)

    print("KERNEL_OK")
</pallas_src>

<mosaic_0001>
module attributes {stable_mosaic.version = 11 : i64} {
  func.func @fused_forward_kernel(%arg0: i32, %arg1: memref<8x64xf32, #tpu.memory_space<vmem>>, %arg2: memref<8x128xf32, #tpu.memory_space<vmem>>, %arg3: memref<8x128xf32, #tpu.memory_space<vmem>>, %arg4: memref<128x128xf32, #tpu.memory_space<vmem>>, %arg5: memref<2x64x128xf32, #tpu.memory_space<vmem>>, %arg6: memref<2x4x16x64xf32, #tpu.memory_space<vmem>>, %arg7: memref<2x64x256xf32, #tpu.memory_space<vmem>>, %arg8: memref<2x128x64xf32, #tpu.memory_space<vmem>>, %arg9: memref<64x256xf32, #tpu.memory_space<vmem>>, %arg10: memref<8x256xf32, #tpu.memory_space<vmem>>) attributes {dimension_semantics = [#tpu.dimension_semantics<parallel>], iteration_bounds = array<i64: 2>, scalar_prefetch = 0 : i64, scratch_operands = 0 : i64, tpu.core_type = #tpu.core_type<tc>, window_params = [{transform_indices = @transform_0, window_bounds = array<i64: 8, 64>}, {pipeline_mode = #tpu.pipeline_mode<synchronous>, transform_indices = @transform_1, window_bounds = array<i64: 8, 128>}, {pipeline_mode = #tpu.pipeline_mode<synchronous>, transform_indices = @transform_2, window_bounds = array<i64: 8, 128>}, {pipeline_mode = #tpu.pipeline_mode<synchronous>, transform_indices = @transform_3, window_bounds = array<i64: 128, 128>}, {pipeline_mode = #tpu.pipeline_mode<synchronous>, transform_indices = @transform_4, window_bounds = array<i64: 2, 64, 128>}, {pipeline_mode = #tpu.pipeline_mode<synchronous>, transform_indices = @transform_5, window_bounds = array<i64: 2, 4, 16, 64>}, {pipeline_mode = #tpu.pipeline_mode<synchronous>, transform_indices = @transform_6, window_bounds = array<i64: 2, 64, 256>}, {pipeline_mode = #tpu.pipeline_mode<synchronous>, transform_indices = @transform_7, window_bounds = array<i64: 2, 128, 64>}, {pipeline_mode = #tpu.pipeline_mode<synchronous>, transform_indices = @transform_8, window_bounds = array<i64: 64, 256>}, {transform_indices = @transform_9, window_bounds = array<i64: 8, 256>}]} {
    %c0 = arith.constant 0 : index
    %c0_0 = arith.constant 0 : index
    %0 = vector.load %arg1[%c0, %c0_0] : memref<8x64xf32, #tpu.memory_space<vmem>>, vector<8x64xf32>
    %c0_1 = arith.constant 0 : index
    %c0_2 = arith.constant 0 : index
    %1 = vector.load %arg2[%c0_1, %c0_2] : memref<8x128xf32, #tpu.memory_space<vmem>>, vector<8x128xf32>
    %c0_3 = arith.constant 0 : index
    %c0_4 = arith.constant 0 : index
    %2 = vector.load %arg3[%c0_3, %c0_4] : memref<8x128xf32, #tpu.memory_space<vmem>>, vector<8x128xf32>
    %c0_5 = arith.constant 0 : index
    %c0_6 = arith.constant 0 : index
    %3 = vector.load %arg4[%c0_5, %c0_6] : memref<128x128xf32, #tpu.memory_space<vmem>>, vector<128x128xf32>
    %4 = arith.mulf %0, %0 : vector<8x64xf32>
    %cst = arith.constant dense<0.000000e+00> : vector<8xf32>
    %5 = vector.multi_reduction <add>, %4, %cst [1] : vector<8x64xf32> to vector<8xf32>
    %6 = vector.shape_cast %5 : vector<8xf32> to vector<8x1xf32>
    %cst_7 = arith.constant 6.400000e+01 : f32
    %7 = vector.broadcast %cst_7 : f32 to vector<8x1xf32>
    %8 = arith.divf %6, %7 : vector<8x1xf32>
    %cst_8 = arith.constant 9.99999974E-6 : f32
    %9 = vector.broadcast %cst_8 : f32 to vector<8x1xf32>
    %10 = arith.addf %8, %9 : vector<8x1xf32>
    %11 = math.rsqrt %10 : vector<8x1xf32>
    %12 = vector.broadcast %11 : vector<8x1xf32> to vector<8x64xf32>
    %13 = arith.mulf %0, %12 : vector<8x64xf32>
    %c0_9 = arith.constant 0 : index
    %c0_10 = arith.constant 0 : index
    %c0_11 = arith.constant 0 : index
    %14 = vector.load %arg5[%c0_9, %c0_10, %c0_11] : memref<2x64x128xf32, #tpu.memory_space<vmem>>, vector<1x64x128xf32>
    %15 = vector.shape_cast %14 : vector<1x64x128xf32> to vector<64x128xf32>
    %cst_12 = arith.constant dense<0.000000e+00> : vector<8x128xf32>
    %16 = tpu.matmul %13, %15, %cst_12 {dimension_numbers = #tpu.dot_dimension_numbers<[1], [0], [0], [1], [0, 0, 1, 1], [], []>} : vector<8x64xf32>, vector<64x128xf32>, vector<8x128xf32> -> vector<8x128xf32>
    %17 = arith.mulf %16, %1 : vector<8x128xf32>
    %cst_13 = arith.constant dense<0.000000e+00> : vector<8x128xf32>
    %18 = tpu.matmul %16, %3, %cst_13 {dimension_numbers = #tpu.dot_dimension_numbers<[1], [0], [0], [1], [0, 0, 1, 1], [], []>} : vector<8x128xf32>, vector<128x128xf32>, vector<8x128xf32> -> vector<8x128xf32>
    %19 = arith.mulf %18, %2 : vector<8x128xf32>
    %20 = arith.addf %17, %19 : vector<8x128xf32>
    %21 = vector.extract_strided_slice %20 {offsets = [0, 0], sizes = [8, 16], strides = [1, 1]} : vector<8x128xf32> to vector<8x16xf32>
    %22 = vector.extract_strided_slice %20 {offsets = [0, 16], sizes = [8, 16], strides = [1, 1]} : vector<8x128xf32> to vector<8x16xf32>
    %23 = vector.extract_strided_slice %20 {offsets = [0, 32], sizes = [8, 16], strides = [1, 1]} : vector<8x128xf32> to vector<8x16xf32>
    %24 = vector.extract_strided_slice %20 {offsets = [0, 48], sizes = [8, 16], strides = [1, 1]} : vector<8x128xf32> to vector<8x16xf32>
    %25 = vector.shape_cast %21 : vector<8x16xf32> to vector<1x8x16xf32>
    %26 = vector.shape_cast %22 : vector<8x16xf32> to vector<1x8x16xf32>
    %27 = vector.shape_cast %23 : vector<8x16xf32> to vector<1x8x16xf32>
    %28 = vector.shape_cast %24 : vector<8x16xf32> to vector<1x8x16xf32>
    %29 = tpu.concatenate %25, %26, %27, %28 in 0 : vector<1x8x16xf32>, vector<1x8x16xf32>, vector<1x8x16xf32>, vector<1x8x16xf32> -> vector<4x8x16xf32>
    %30 = vector.extract_strided_slice %20 {offsets = [0, 64], sizes = [8, 16], strides = [1, 1]} : vector<8x128xf32> to vector<8x16xf32>
    %31 = vector.extract_strided_slice %20 {offsets = [0, 64], sizes = [8, 16], strides = [1, 1]} : vector<8x128xf32> to vector<8x16xf32>
    %32 = vector.extract_strided_slice %20 {offsets = [0, 80], sizes = [8, 16], strides = [1, 1]} : vector<8x128xf32> to vector<8x16xf32>
    %33 = vector.extract_strided_slice %20 {offsets = [0, 80], sizes = [8, 16], strides = [1, 1]} : vector<8x128xf32> to vector<8x16xf32>
    %34 = vector.shape_cast %30 : vector<8x16xf32> to vector<1x8x16xf32>
    %35 = vector.shape_cast %31 : vector<8x16xf32> to vector<1x8x16xf32>
    %36 = vector.shape_cast %32 : vector<8x16xf32> to vector<1x8x16xf32>
    %37 = vector.shape_cast %33 : vector<8x16xf32> to vector<1x8x16xf32>
    %38 = tpu.concatenate %34, %35, %36, %37 in 0 : vector<1x8x16xf32>, vector<1x8x16xf32>, vector<1x8x16xf32>, vector<1x8x16xf32> -> vector<4x8x16xf32>
    %39 = vector.extract_strided_slice %20 {offsets = [0, 96], sizes = [8, 16], strides = [1, 1]} : vector<8x128xf32> to vector<8x16xf32>
    %40 = vector.extract_strided_slice %20 {offsets = [0, 96], sizes = [8, 16], strides = [1, 1]} : vector<8x128xf32> to vector<8x16xf32>
    %41 = vector.extract_strided_slice %20 {offsets = [0, 112], sizes = [8, 16], strides = [1, 1]} : vector<8x128xf32> to vector<8x16xf32>
    %42 = vector.extract_strided_slice %20 {offsets = [0, 112], sizes = [8, 16], strides = [1, 1]} : vector<8x128xf32> to vector<8x16xf32>
    %43 = vector.shape_cast %39 : vector<8x16xf32> to vector<1x8x16xf32>
    %44 = vector.shape_cast %40 : vector<8x16xf32> to vector<1x8x16xf32>
    %45 = vector.shape_cast %41 : vector<8x16xf32> to vector<1x8x16xf32>
    %46 = vector.shape_cast %42 : vector<8x16xf32> to vector<1x8x16xf32>
    %47 = tpu.concatenate %43, %44, %45, %46 in 0 : vector<1x8x16xf32>, vector<1x8x16xf32>, vector<1x8x16xf32>, vector<1x8x16xf32> -> vector<4x8x16xf32>
    %cst_14 = arith.constant dense<0.000000e+00> : vector<4x8x8xf32>
    %48 = tpu.matmul %29, %38, %cst_14 {dimension_numbers = #tpu.dot_dimension_numbers<[2], [2], [1], [1], [0, 0, 0, 1, 1, 1], [0], [0]>} : vector<4x8x16xf32>, vector<4x8x16xf32>, vector<4x8x8xf32> -> vector<4x8x8xf32>
    %cst_15 = arith.constant 2.500000e-01 : f32
    %49 = vector.broadcast %cst_15 : f32 to vector<4x8x8xf32>
    %50 = arith.mulf %48, %49 : vector<4x8x8xf32>
    %cst_16 = arith.constant dense<0xFF800000> : vector<4x8xf32>
    %51 = vector.multi_reduction <maximumf>, %50, %cst_16 [2] : vector<4x8x8xf32> to vector<4x8xf32>
    %52 = vector.shape_cast %51 : vector<4x8xf32> to vector<4x8x1xf32>
    %53 = vector.broadcast %52 : vector<4x8x1xf32> to vector<4x8x8xf32>
    %54 = arith.subf %50, %53 : vector<4x8x8xf32>
    %55 = math.exp %54 : vector<4x8x8xf32>
    %cst_17 = arith.constant dense<0.000000e+00> : vector<4x8xf32>
    %56 = vector.multi_reduction <add>, %55, %cst_17 [2] : vector<4x8x8xf32> to vector<4x8xf32>
    %57 = vector.shape_cast %56 : vector<4x8xf32> to vector<4x8x1xf32>
    %58 = tpu.reciprocal %57 {approx = true} : vector<4x8x1xf32> -> vector<4x8x1xf32>
    %59 = vector.broadcast %58 : vector<4x8x1xf32> to vector<4x8x8xf32>
    %60 = arith.mulf %55, %59 : vector<4x8x8xf32>
    %cst_18 = arith.constant dense<0.000000e+00> : vector<4x8x16xf32>
    %61 = tpu.matmul %60, %47, %cst_18 {dimension_numbers = #tpu.dot_dimension_numbers<[2], [1], [1], [2], [0, 0, 0, 1, 1, 2], [0], [0]>} : vector<4x8x8xf32>, vector<4x8x16xf32>, vector<4x8x16xf32> -> vector<4x8x16xf32>
    %c0_19 = arith.constant 0 : index
    %c0_20 = arith.constant 0 : index
    %c0_21 = arith.constant 0 : index
    %c0_22 = arith.constant 0 : index
    %62 = vector.load %arg6[%c0_19, %c0_20, %c0_21, %c0_22] : memref<2x4x16x64xf32, #tpu.memory_space<vmem>>, vector<1x4x16x64xf32>
    %63 = vector.shape_cast %62 : vector<1x4x16x64xf32> to vector<4x16x64xf32>
    %cst_23 = arith.constant dense<0.000000e+00> : vector<4x8x64xf32>
    %64 = tpu.matmul %61, %63, %cst_23 {dimension_numbers = #tpu.dot_dimension_numbers<[2], [1], [1], [2], [0, 0, 0, 1, 1, 2], [0], [0]>} : vector<4x8x16xf32>, vector<4x16x64xf32>, vector<4x8x64xf32> -> vector<4x8x64xf32>
    %cst_24 = arith.constant dense<0.000000e+00> : vector<8x64xf32>
    %65 = vector.multi_reduction <add>, %64, %cst_24 [0] : vector<4x8x64xf32> to vector<8x64xf32>
    %66 = arith.addf %0, %65 : vector<8x64xf32>
    %67 = arith.mulf %66, %66 : vector<8x64xf32>
    %cst_25 = arith.constant dense<0.000000e+00> : vector<8xf32>
    %68 = vector.multi_reduction <add>, %67, %cst_25 [1] : vector<8x64xf32> to vector<8xf32>
    %69 = vector.shape_cast %68 : vector<8xf32> to vector<8x1xf32>
    %cst_26 = arith.constant 6.400000e+01 : f32
    %70 = vector.broadcast %cst_26 : f32 to vector<8x1xf32>
    %71 = arith.divf %69, %70 : vector<8x1xf32>
    %cst_27 = arith.constant 9.99999974E-6 : f32
    %72 = vector.broadcast %cst_27 : f32 to vector<8x1xf32>
    %73 = arith.addf %71, %72 : vector<8x1xf32>
    %74 = math.rsqrt %73 : vector<8x1xf32>
    %75 = vector.broadcast %74 : vector<8x1xf32> to vector<8x64xf32>
    %76 = arith.mulf %66, %75 : vector<8x64xf32>
    %c0_28 = arith.constant 0 : index
    %c0_29 = arith.constant 0 : index
    %c0_30 = arith.constant 0 : index
    %77 = vector.load %arg7[%c0_28, %c0_29, %c0_30] : memref<2x64x256xf32, #tpu.memory_space<vmem>>, vector<1x64x256xf32>
    %78 = vector.shape_cast %77 : vector<1x64x256xf32> to vector<64x256xf32>
    %cst_31 = arith.constant dense<0.000000e+00> : vector<8x256xf32>
    %79 = tpu.matmul %76, %78, %cst_31 {dimension_numbers = #tpu.dot_dimension_numbers<[1], [0], [0], [1], [0, 0, 1, 1], [], []>} : vector<8x64xf32>, vector<64x256xf32>, vector<8x256xf32> -> vector<8x256xf32>
    %80 = vector.extract_strided_slice %79 {offsets = [0, 0], sizes = [8, 128], strides = [1, 1]} : vector<8x256xf32> to vector<8x128xf32>
    %81 = vector.extract_strided_slice %79 {offsets = [0, 128], sizes = [8, 128], strides = [1, 1]} : vector<8x256xf32> to vector<8x128xf32>
    %82 = arith.negf %80 : vector<8x128xf32>
    %83 = math.exp %82 : vector<8x128xf32>
    %cst_32 = arith.constant 1.000000e+00 : f32
    %84 = vector.broadcast %cst_32 : f32 to vector<8x128xf32>
    %85 = arith.addf %84, %83 : vector<8x128xf32>
    %86 = arith.divf %84, %85 : vector<8x128xf32>
    %87 = arith.mulf %80, %86 : vector<8x128xf32>
    %88 = arith.mulf %87, %81 : vector<8x128xf32>
    %c0_33 = arith.constant 0 : index
    %c0_34 = arith.constant 0 : index
    %c0_35 = arith.constant 0 : index
    %89 = vector.load %arg8[%c0_33, %c0_34, %c0_35] : memref<2x128x64xf32, #tpu.memory_space<vmem>>, vector<1x128x64xf32>
    %90 = vector.shape_cast %89 : vector<1x128x64xf32> to vector<128x64xf32>
    %cst_36 = arith.constant dense<0.000000e+00> : vector<8x64xf32>
    %91 = tpu.matmul %88, %90, %cst_36 {dimension_numbers = #tpu.dot_dimension_numbers<[1], [0], [0], [1], [0, 0, 1, 1], [], []>} : vector<8x128xf32>, vector<128x64xf32>, vector<8x64xf32> -> vector<8x64xf32>
    %92 = arith.addf %66, %91 : vector<8x64xf32>
    %93 = arith.mulf %92, %92 : vector<8x64xf32>
    %cst_37 = arith.constant dense<0.000000e+00> : vector<8xf32>
    %94 = vector.multi_reduction <add>, %93, %cst_37 [1] : vector<8x64xf32> to vector<8xf32>
    %95 = vector.shape_cast %94 : vector<8xf32> to vector<8x1xf32>
    %cst_38 = arith.constant 6.400000e+01 : f32
    %96 = vector.broadcast %cst_38 : f32 to vector<8x1xf32>
    %97 = arith.divf %95, %96 : vector<8x1xf32>
    %cst_39 = arith.constant 9.99999974E-6 : f32
    %98 = vector.broadcast %cst_39 : f32 to vector<8x1xf32>
    %99 = arith.addf %97, %98 : vector<8x1xf32>
    %100 = math.rsqrt %99 : vector<8x1xf32>
    %101 = vector.broadcast %100 : vector<8x1xf32> to vector<8x64xf32>
    %102 = arith.mulf %92, %101 : vector<8x64xf32>
    %c1 = arith.constant 1 : index
    %c0_40 = arith.constant 0 : index
    %c0_41 = arith.constant 0 : index
    %103 = vector.load %arg5[%c1, %c0_40, %c0_41] : memref<2x64x128xf32, #tpu.memory_space<vmem>>, vector<1x64x128xf32>
    %104 = vector.shape_cast %103 : vector<1x64x128xf32> to vector<64x128xf32>
    %cst_42 = arith.constant dense<0.000000e+00> : vector<8x128xf32>
    %105 = tpu.matmul %102, %104, %cst_42 {dimension_numbers = #tpu.dot_dimension_numbers<[1], [0], [0], [1], [0, 0, 1, 1], [], []>} : vector<8x64xf32>, vector<64x128xf32>, vector<8x128xf32> -> vector<8x128xf32>
    %106 = arith.mulf %105, %1 : vector<8x128xf32>
    %cst_43 = arith.constant dense<0.000000e+00> : vector<8x128xf32>
    %107 = tpu.matmul %105, %3, %cst_43 {dimension_numbers = #tpu.dot_dimension_numbers<[1], [0], [0], [1], [0, 0, 1, 1], [], []>} : vector<8x128xf32>, vector<128x128xf32>, vector<8x128xf32> -> vector<8x128xf32>
    %108 = arith.mulf %107, %2 : vector<8x128xf32>
    %109 = arith.addf %106, %108 : vector<8x128xf32>
    %110 = vector.extract_strided_slice %109 {offsets = [0, 0], sizes = [8, 16], strides = [1, 1]} : vector<8x128xf32> to vector<8x16xf32>
    %111 = vector.extract_strided_slice %109 {offsets = [0, 16], sizes = [8, 16], strides = [1, 1]} : vector<8x128xf32> to vector<8x16xf32>
    %112 = vector.extract_strided_slice %109 {offsets = [0, 32], sizes = [8, 16], strides = [1, 1]} : vector<8x128xf32> to vector<8x16xf32>
    %113 = vector.extract_strided_slice %109 {offsets = [0, 48], sizes = [8, 16], strides = [1, 1]} : vector<8x128xf32> to vector<8x16xf32>
    %114 = vector.shape_cast %110 : vector<8x16xf32> to vector<1x8x16xf32>
    %115 = vector.shape_cast %111 : vector<8x16xf32> to vector<1x8x16xf32>
    %116 = vector.shape_cast %112 : vector<8x16xf32> to vector<1x8x16xf32>
    %117 = vector.shape_cast %113 : vector<8x16xf32> to vector<1x8x16xf32>
    %118 = tpu.concatenate %114, %115, %116, %117 in 0 : vector<1x8x16xf32>, vector<1x8x16xf32>, vector<1x8x16xf32>, vector<1x8x16xf32> -> vector<4x8x16xf32>
    %119 = vector.extract_strided_slice %109 {offsets = [0, 64], sizes = [8, 16], strides = [1, 1]} : vector<8x128xf32> to vector<8x16xf32>
    %120 = vector.extract_strided_slice %109 {offsets = [0, 64], sizes = [8, 16], strides = [1, 1]} : vector<8x128xf32> to vector<8x16xf32>
    %121 = vector.extract_strided_slice %109 {offsets = [0, 80], sizes = [8, 16], strides = [1, 1]} : vector<8x128xf32> to vector<8x16xf32>
    %122 = vector.extract_strided_slice %109 {offsets = [0, 80], sizes = [8, 16], strides = [1, 1]} : vector<8x128xf32> to vector<8x16xf32>
    %123 = vector.shape_cast %119 : vector<8x16xf32> to vector<1x8x16xf32>
    %124 = vector.shape_cast %120 : vector<8x16xf32> to vector<1x8x16xf32>
    %125 = vector.shape_cast %121 : vector<8x16xf32> to vector<1x8x16xf32>
    %126 = vector.shape_cast %122 : vector<8x16xf32> to vector<1x8x16xf32>
    %127 = tpu.concatenate %123, %124, %125, %126 in 0 : vector<1x8x16xf32>, vector<1x8x16xf32>, vector<1x8x16xf32>, vector<1x8x16xf32> -> vector<4x8x16xf32>
    %128 = vector.extract_strided_slice %109 {offsets = [0, 96], sizes = [8, 16], strides = [1, 1]} : vector<8x128xf32> to vector<8x16xf32>
    %129 = vector.extract_strided_slice %109 {offsets = [0, 96], sizes = [8, 16], strides = [1, 1]} : vector<8x128xf32> to vector<8x16xf32>
    %130 = vector.extract_strided_slice %109 {offsets = [0, 112], sizes = [8, 16], strides = [1, 1]} : vector<8x128xf32> to vector<8x16xf32>
    %131 = vector.extract_strided_slice %109 {offsets = [0, 112], sizes = [8, 16], strides = [1, 1]} : vector<8x128xf32> to vector<8x16xf32>
    %132 = vector.shape_cast %128 : vector<8x16xf32> to vector<1x8x16xf32>
    %133 = vector.shape_cast %129 : vector<8x16xf32> to vector<1x8x16xf32>
    %134 = vector.shape_cast %130 : vector<8x16xf32> to vector<1x8x16xf32>
    %135 = vector.shape_cast %131 : vector<8x16xf32> to vector<1x8x16xf32>
    %136 = tpu.concatenate %132, %133, %134, %135 in 0 : vector<1x8x16xf32>, vector<1x8x16xf32>, vector<1x8x16xf32>, vector<1x8x16xf32> -> vector<4x8x16xf32>
    %cst_44 = arith.constant dense<0.000000e+00> : vector<4x8x8xf32>
    %137 = tpu.matmul %118, %127, %cst_44 {dimension_numbers = #tpu.dot_dimension_numbers<[2], [2], [1], [1], [0, 0, 0, 1, 1, 1], [0], [0]>} : vector<4x8x16xf32>, vector<4x8x16xf32>, vector<4x8x8xf32> -> vector<4x8x8xf32>
    %cst_45 = arith.constant 2.500000e-01 : f32
    %138 = vector.broadcast %cst_45 : f32 to vector<4x8x8xf32>
    %139 = arith.mulf %137, %138 : vector<4x8x8xf32>
    %cst_46 = arith.constant dense<0xFF800000> : vector<4x8xf32>
    %140 = vector.multi_reduction <maximumf>, %139, %cst_46 [2] : vector<4x8x8xf32> to vector<4x8xf32>
    %141 = vector.shape_cast %140 : vector<4x8xf32> to vector<4x8x1xf32>
    %142 = vector.broadcast %141 : vector<4x8x1xf32> to vector<4x8x8xf32>
    %143 = arith.subf %139, %142 : vector<4x8x8xf32>
    %144 = math.exp %143 : vector<4x8x8xf32>
    %cst_47 = arith.constant dense<0.000000e+00> : vector<4x8xf32>
    %145 = vector.multi_reduction <add>, %144, %cst_47 [2] : vector<4x8x8xf32> to vector<4x8xf32>
    %146 = vector.shape_cast %145 : vector<4x8xf32> to vector<4x8x1xf32>
    %147 = tpu.reciprocal %146 {approx = true} : vector<4x8x1xf32> -> vector<4x8x1xf32>
    %148 = vector.broadcast %147 : vector<4x8x1xf32> to vector<4x8x8xf32>
    %149 = arith.mulf %144, %148 : vector<4x8x8xf32>
    %cst_48 = arith.constant dense<0.000000e+00> : vector<4x8x16xf32>
    %150 = tpu.matmul %149, %136, %cst_48 {dimension_numbers = #tpu.dot_dimension_numbers<[2], [1], [1], [2], [0, 0, 0, 1, 1, 2], [0], [0]>} : vector<4x8x8xf32>, vector<4x8x16xf32>, vector<4x8x16xf32> -> vector<4x8x16xf32>
    %c1_49 = arith.constant 1 : index
    %c0_50 = arith.constant 0 : index
    %c0_51 = arith.constant 0 : index
    %c0_52 = arith.constant 0 : index
    %151 = vector.load %arg6[%c1_49, %c0_50, %c0_51, %c0_52] : memref<2x4x16x64xf32, #tpu.memory_space<vmem>>, vector<1x4x16x64xf32>
    %152 = vector.shape_cast %151 : vector<1x4x16x64xf32> to vector<4x16x64xf32>
    %cst_53 = arith.constant dense<0.000000e+00> : vector<4x8x64xf32>
    %153 = tpu.matmul %150, %152, %cst_53 {dimension_numbers = #tpu.dot_dimension_numbers<[2], [1], [1], [2], [0, 0, 0, 1, 1, 2], [0], [0]>} : vector<4x8x16xf32>, vector<4x16x64xf32>, vector<4x8x64xf32> -> vector<4x8x64xf32>
    %cst_54 = arith.constant dense<0.000000e+00> : vector<8x64xf32>
    %154 = vector.multi_reduction <add>, %153, %cst_54 [0] : vector<4x8x64xf32> to vector<8x64xf32>
    %155 = arith.addf %92, %154 : vector<8x64xf32>
    %156 = arith.mulf %155, %155 : vector<8x64xf32>
    %cst_55 = arith.constant dense<0.000000e+00> : vector<8xf32>
    %157 = vector.multi_reduction <add>, %156, %cst_55 [1] : vector<8x64xf32> to vector<8xf32>
    %158 = vector.shape_cast %157 : vector<8xf32> to vector<8x1xf32>
    %cst_56 = arith.constant 6.400000e+01 : f32
    %159 = vector.broadcast %cst_56 : f32 to vector<8x1xf32>
    %160 = arith.divf %158, %159 : vector<8x1xf32>
    %cst_57 = arith.constant 9.99999974E-6 : f32
    %161 = vector.broadcast %cst_57 : f32 to vector<8x1xf32>
    %162 = arith.addf %160, %161 : vector<8x1xf32>
    %163 = math.rsqrt %162 : vector<8x1xf32>
    %164 = vector.broadcast %163 : vector<8x1xf32> to vector<8x64xf32>
    %165 = arith.mulf %155, %164 : vector<8x64xf32>
    %c1_58 = arith.constant 1 : index
    %c0_59 = arith.constant 0 : index
    %c0_60 = arith.constant 0 : index
    %166 = vector.load %arg7[%c1_58, %c0_59, %c0_60] : memref<2x64x256xf32, #tpu.memory_space<vmem>>, vector<1x64x256xf32>
    %167 = vector.shape_cast %166 : vector<1x64x256xf32> to vector<64x256xf32>
    %cst_61 = arith.constant dense<0.000000e+00> : vector<8x256xf32>
    %168 = tpu.matmul %165, %167, %cst_61 {dimension_numbers = #tpu.dot_dimension_numbers<[1], [0], [0], [1], [0, 0, 1, 1], [], []>} : vector<8x64xf32>, vector<64x256xf32>, vector<8x256xf32> -> vector<8x256xf32>
    %169 = vector.extract_strided_slice %168 {offsets = [0, 0], sizes = [8, 128], strides = [1, 1]} : vector<8x256xf32> to vector<8x128xf32>
    %170 = vector.extract_strided_slice %168 {offsets = [0, 128], sizes = [8, 128], strides = [1, 1]} : vector<8x256xf32> to vector<8x128xf32>
    %171 = arith.negf %169 : vector<8x128xf32>
    %172 = math.exp %171 : vector<8x128xf32>
    %cst_62 = arith.constant 1.000000e+00 : f32
    %173 = vector.broadcast %cst_62 : f32 to vector<8x128xf32>
    %174 = arith.addf %173, %172 : vector<8x128xf32>
    %175 = arith.divf %173, %174 : vector<8x128xf32>
    %176 = arith.mulf %169, %175 : vector<8x128xf32>
    %177 = arith.mulf %176, %170 : vector<8x128xf32>
    %c1_63 = arith.constant 1 : index
    %c0_64 = arith.constant 0 : index
    %c0_65 = arith.constant 0 : index
    %178 = vector.load %arg8[%c1_63, %c0_64, %c0_65] : memref<2x128x64xf32, #tpu.memory_space<vmem>>, vector<1x128x64xf32>
    %179 = vector.shape_cast %178 : vector<1x128x64xf32> to vector<128x64xf32>
    %cst_66 = arith.constant dense<0.000000e+00> : vector<8x64xf32>
    %180 = tpu.matmul %177, %179, %cst_66 {dimension_numbers = #tpu.dot_dimension_numbers<[1], [0], [0], [1], [0, 0, 1, 1], [], []>} : vector<8x128xf32>, vector<128x64xf32>, vector<8x64xf32> -> vector<8x64xf32>
    %181 = arith.addf %155, %180 : vector<8x64xf32>
    %182 = arith.mulf %181, %181 : vector<8x64xf32>
    %cst_67 = arith.constant dense<0.000000e+00> : vector<8xf32>
    %183 = vector.multi_reduction <add>, %182, %cst_67 [1] : vector<8x64xf32> to vector<8xf32>
    %184 = vector.shape_cast %183 : vector<8xf32> to vector<8x1xf32>
    %cst_68 = arith.constant 6.400000e+01 : f32
    %185 = vector.broadcast %cst_68 : f32 to vector<8x1xf32>
    %186 = arith.divf %184, %185 : vector<8x1xf32>
    %cst_69 = arith.constant 9.99999974E-6 : f32
    %187 = vector.broadcast %cst_69 : f32 to vector<8x1xf32>
    %188 = arith.addf %186, %187 : vector<8x1xf32>
    %189 = math.rsqrt %188 : vector<8x1xf32>
    %190 = vector.broadcast %189 : vector<8x1xf32> to vector<8x64xf32>
    %191 = arith.mulf %181, %190 : vector<8x64xf32>
    %c0_70 = arith.constant 0 : index
    %c0_71 = arith.constant 0 : index
    %192 = vector.load %arg9[%c0_70, %c0_71] : memref<64x256xf32, #tpu.memory_space<vmem>>, vector<64x256xf32>
    %cst_72 = arith.constant dense<0.000000e+00> : vector<8x256xf32>
    %193 = tpu.matmul %191, %192, %cst_72 {dimension_numbers = #tpu.dot_dimension_numbers<[1], [0], [0], [1], [0, 0, 1, 1], [], []>} : vector<8x64xf32>, vector<64x256xf32>, vector<8x256xf32> -> vector<8x256xf32>
    %c0_73 = arith.constant 0 : index
    %c0_74 = arith.constant 0 : index
    %194 = vector.load %arg10[%c0_73, %c0_74] : memref<8x256xf32, #tpu.memory_space<vmem>>, vector<8x256xf32>
    tpu.vector_store %arg10[%c0_73, %c0_74], %193 {strides = array<i32>} : memref<8x256xf32, #tpu.memory_space<vmem>>, vector<8x256xf32>,
    return
  }
  func.func @transform_0(%arg0: i32) -> (i32, i32) {
    %c0_i32 = arith.constant 0 : i32
    %c0_i32_0 = arith.constant 0 : i32
    return %arg0, %c0_i32 : i32, i32
  }
  func.func @transform_1(%arg0: i32) -> (i32, i32) {
    %c0_i32 = arith.constant 0 : i32
    %c0_i32_0 = arith.constant 0 : i32
    %c0_i32_1 = arith.constant 0 : i32
    return %c0_i32, %c0_i32_0 : i32, i32
  }
  func.func @transform_2(%arg0: i32) -> (i32, i32) {
    %c0_i32 = arith.constant 0 : i32
    %c0_i32_0 = arith.constant 0 : i32
    %c0_i32_1 = arith.constant 0 : i32
    return %c0_i32, %c0_i32_0 : i32, i32
  }
  func.func @transform_3(%arg0: i32) -> (i32, i32) {
    %c0_i32 = arith.constant 0 : i32
    %c0_i32_0 = arith.constant 0 : i32
    %c0_i32_1 = arith.constant 0 : i32
    return %c0_i32, %c0_i32_0 : i32, i32
  }
  func.func @transform_4(%arg0: i32) -> (i32, i32, i32) {
    %c0_i32 = arith.constant 0 : i32
    %c0_i32_0 = arith.constant 0 : i32
    %c0_i32_1 = arith.constant 0 : i32
    %c0_i32_2 = arith.constant 0 : i32
    return %c0_i32, %c0_i32_0, %c0_i32_1 : i32, i32, i32
  }
  func.func @transform_5(%arg0: i32) -> (i32, i32, i32, i32) {
    %c0_i32 = arith.constant 0 : i32
    %c0_i32_0 = arith.constant 0 : i32
    %c0_i32_1 = arith.constant 0 : i32
    %c0_i32_2 = arith.constant 0 : i32
    %c0_i32_3 = arith.constant 0 : i32
    return %c0_i32, %c0_i32_0, %c0_i32_1, %c0_i32_2 : i32, i32, i32, i32
  }
  func.func @transform_6(%arg0: i32) -> (i32, i32, i32) {
    %c0_i32 = arith.constant 0 : i32
    %c0_i32_0 = arith.constant 0 : i32
    %c0_i32_1 = arith.constant 0 : i32
    %c0_i32_2 = arith.constant 0 : i32
    return %c0_i32, %c0_i32_0, %c0_i32_1 : i32, i32, i32
  }
  func.func @transform_7(%arg0: i32) -> (i32, i32, i32) {
    %c0_i32 = arith.constant 0 : i32
    %c0_i32_0 = arith.constant 0 : i32
    %c0_i32_1 = arith.constant 0 : i32
    %c0_i32_2 = arith.constant 0 : i32
    return %c0_i32, %c0_i32_0, %c0_i32_1 : i32, i32, i32
  }
  func.func @transform_8(%arg0: i32) -> (i32, i32) {
    %c0_i32 = arith.constant 0 : i32
    %c0_i32_0 = arith.constant 0 : i32
    %c0_i32_1 = arith.constant 0 : i32
    return %c0_i32, %c0_i32_0 : i32, i32
  }
  func.func @transform_9(%arg0: i32) -> (i32, i32) {
    %c0_i32 = arith.constant 0 : i32
    %c0_i32_0 = arith.constant 0 : i32
    return %arg0, %c0_i32 : i32, i32
  }
}

</mosaic_0001>

<bundles_post_ra>
// kernel: tpu_custom_call.1
= control target key start
LH: loop header
LB: loop body
LE: loop exit
PB: predicated region body
PF: predicated region fallthrough
CT: control target
= control target key end

     0   :  { %s5078_s0 = inlined_call_operand.hbm [shape: f32[16,64], index: 0, kind: input, shape index: {}]   ;;  %s5079_s1 = inlined_call_operand.vmem [shape: f32[8,128], index: 1, kind: input, shape index: {}]   ;;  %s5080_s2 = inlined_call_operand.hbm [shape: f32[8,128], index: 2, kind: input, shape index: {}]   ;;  %s5081_s3 = inlined_call_operand.vmem [shape: f32[128,128], index: 3, kind: input, shape index: {}]   ;;  %s5082_s4 = inlined_call_operand.hbm [shape: f32[2,64,128], index: 4, kind: input, shape index: {}]   ;;  %s5083_s5 = inlined_call_operand.hbm [shape: f32[2,4,16,64], index: 5, kind: input, shape index: {}]   ;;  %s5084_s6 = inlined_call_operand.vmem [shape: f32[2,64,256], index: 6, kind: input, shape index: {}]   ;;  %s5085_s7 = inlined_call_operand.vmem [shape: f32[2,128,64], index: 7, kind: input, shape index: {}]   ;;  %s5086_s8 = inlined_call_operand.hbm [shape: f32[64,256], index: 8, kind: input, shape index: {}]   ;;  %s5087_s9 = inlined_call_operand.hbm [shape: f32[16,256], index: 9, kind: output, shape index: {}]  }
   0x1   :  { %5092 = sst [smem:[#allocation16_spill]] %s5080_s2 }
   0x2   :  { %5093 = sst [smem:[#allocation17_spill]] %s5082_s4 }
   0x3   :  { %5094 = sst [smem:[#allocation18_spill]] %s5083_s5 }
   0x4   :  { %5095 = sst [smem:[#allocation19_spill]] %s5086_s8 }
   0x5   :  { %14 = vsyncpa [#allocation3], 0 }
   0x6   :  { %16 = vsyncpa [#allocation3 + $0x1], 0 }
   0x7   :  { %17 = vsyncpa [#allocation6], 0 }
   0x8   :  { %18 = vsyncpa [#allocation9], 0 }
   0x9   :  { %19 = vsyncpa [#allocation4], 0 }
   0xa   :  { %21 = vsyncpa [#allocation4 + $0x1], 0  ;;  %s4248_s30 = smov 0   ;;  %s4250_s10 = smov 0  }
   0xb   :  { %s4252_s11 = smov 0   ;;  %s4254_s12 = smov 0  }
   0xc LB: > { %s4181_s13 = smov [#allocation5]   ;;  %s4269_s15 = sadd.s32 4294967295, %s4179_s12   ;;  %s4179_s12 = sphi %s4254_s12, %s5119_s12   ;;  %s4175_s11 = sphi %s4252_s11, %s5118_s11   ;;  %s4171_s10 = sphi %s4250_s10, %s5117_s10   ;;  %s4167_s30 = sphi %s4248_s30, %s5116_s30  }
   0xd   : > { %s268_s14 = sshll.u32 %s4181_s13, 4  ;;  %p3279_p0 = scmp.ge.s32.totalorder %s4179_s12, 1  ;;  %s269_s14 = int_to_ptr.vmem [resolvable:$true] %s268_s14 }
   0xe   : > { %p5088_p1 = scmp.eq.s32.totalorder %s4269_s15, 0  ;;  %p252_p2 = scmp.lt.s32.totalorder %s4179_s12, 3 }
   0xf   : > { %s4182_s17 = smov [#allocation8]   ;;  %s4183_s20 = smov [#allocation7]  }
  0x10   : > { %p4274_p3 = pnand %p3279_p0, %p252_p2  ;;  %s294_s18 = sshll.u32 %s4182_s17, 4  ;;  %s4287_s18 = int_to_ptr.vmem [resolvable:$true] %s294_s18 }
  0x11   : > { %s281_s21 = sshll.u32 %s4183_s20, 4  ;;  %s3986_s22 = scalar_lea.vmem %s269_s14, 128  ;;  %s4289_s21 = int_to_ptr.vmem [resolvable:$true] %s281_s21 }
  0x12   : > { %s5096_s16 = scalar_select %p4274_p3, 1, 0 }
  0x13   : > { %p3847_p5 = pneg %p4274_p3  ;;  %p3987_p8 = scmp.ne.s32.totalorder %s269_s14, %s3986_s22 }
  0x14   : > { %p3994_p11 = scmp.lt.s32.totalorder %s269_s14, %s269_s14  ;;  %p3995_p12 = scmp.lt.s32.totalorder %s3986_s22, %s3986_s22 }
  0x15   : > { %p4283_p6 = pnand %p3847_p5, %p5088_p1 }
  0x16   : > { %p3996_p13 = por %p3995_p12, %p3994_p11 }
  0x17   : > { %p3977_p7 = pneg %p4283_p6 }
  0x19   : > { %p3989_p9 = pnand %p3987_p8, %p3977_p7 }
  0x1b   : > { %p3990_p10 = pneg %p3989_p9 }
  0x1d   : > { %p3997_p0 = pnand %p3996_p13, %p3990_p10 }
  0x1f   : > { %4000 = shalt.err (!%p3997_p0)
}
  0x20   : > { %s5098_s2 = sld [smem:[#allocation16_spill]]  ;;  %s4012_s25 = scalar_lea.vmem %s4287_s18, 2048 }
  0x21   : > { %p4013_p2 = scmp.ne.s32.totalorder %s4287_s18, %s4012_s25  ;;  %p4020_p9 = scmp.lt.s32.totalorder %s4287_s18, %s4287_s18 }
  0x22   : > { %p4021_p10 = scmp.lt.s32.totalorder %s4012_s25, %s4012_s25 }
  0x23   : > { %p4015_p5 = pnand %p4013_p2, %p3977_p7 }
  0x24   : > { %p4022_p11 = por %p4021_p10, %p4020_p9 }
  0x25   : > { %p4016_p8 = pneg %p4015_p5 }
  0x26   : > { %3850 = dma.hbm_to_vmem [thread:$0]  (!%p4283_p6), %s5098_s2, 128, %s269_s14, [#allocation6]  }
  0x27   : > { %p4023_p12 = pnand %p4022_p11, %p4016_p8 }
  0x29   : > { %4026 = shalt.err (!%p4023_p12)
}
  0x2a   : > { %s4184_s26 = smov 128   ;;  %s4185_s27 = smov 8  }
  0x2b   : > { %s5099_s5 = sld [smem:[#allocation18_spill]]  ;;  %s4038_s13 = scalar_lea.vmem %s4289_s21, 2048 }
  0x2c   : > { %p4039_p13 = scmp.ne.s32.totalorder %s4289_s21, %s4038_s13  ;;  %p4046_p5 = scmp.lt.s32.totalorder %s4289_s21, %s4289_s21 }
  0x2d   : > { %p4047_p8 = scmp.lt.s32.totalorder %s4038_s13, %s4038_s13 }
  0x2e   : > { %p4041_p0 = pnand %p4039_p13, %p3977_p7 }
  0x2f   : > { %p4048_p9 = por %p4047_p8, %p4046_p5 }
  0x30   : > { %p4042_p2 = pneg %p4041_p0 }
  0x31   : > { %3856 = dma.hbm_to_vmem [thread:$0]  (!%p4283_p6), %s5099_s5, 2048, %s4287_s18, [#allocation9], %s4184_s26, %s4184_s26, %s4185_s27  }
  0x32   : > { %p4049_p10 = pnand %p4048_p9, %p4042_p2 }
  0x34   : > { %4052 = shalt.err (!%p4049_p10)
}
  0x35   : > { %s5100_s4 = sld [smem:[#allocation17_spill]]  ;;  %s4186_s18 = smov [#allocation10]  }
  0x36   : > { %s313_s20 = sshll.u32 %s4186_s18, 4  ;;  %s314_s20 = int_to_ptr.vmem [resolvable:$true] %s313_s20 }
  0x37   : > { %s4064_s22 = scalar_lea.vmem %s314_s20, 2048  ;;  %p4072_p0 = scmp.lt.s32.totalorder %s314_s20, %s314_s20 }
  0x38   : > { %p4065_p11 = scmp.ne.s32.totalorder %s314_s20, %s4064_s22  ;;  %p4073_p2 = scmp.lt.s32.totalorder %s4064_s22, %s4064_s22 }
  0x3a   : > { %p4067_p12 = pnand %p4065_p11, %p3977_p7  ;;  %p4074_p5 = por %p4073_p2, %p4072_p0 }
  0x3b   : > { %3853 = dma.hbm_to_vmem [thread:$0]  (!%p4283_p6), %s5100_s4, 2048, %s4289_s21, [#allocation6], %s4184_s26, %s4184_s26, %s4185_s27  }
  0x3c   : > { %p4068_p13 = pneg %p4067_p12 }
  0x3e   : > { %p4075_p8 = pnand %p4074_p5, %p4068_p13 }
  0x40   : > { %4078 = shalt.err (!%p4075_p8)
}
  0x41   : > { %s4187_s23 = smov 256   ;;  %s4188_s21 = smov 16  }
  0x42   : > { %s5101_s8 = sld [smem:[#allocation19_spill]]  ;;  %s3278_s26 = sadd.s32 4294967294, %s4179_s12  }
  0x43   : > { %s4337_s27 = sadd.s32 1, %s4179_s12   ;;  %s34_s29 = sadd.s32 1, %s4175_s11 }
  0x44   : > { %s31_s28 = ssub.s32 %s4179_s12, %s4337_s27  ;;  %p41_p9 = scmp.ne.s32.totalorder %s4175_s11, %s4171_s10 }
  0x45   : > { %p32_p7 = scmp.eq.s32.totalorder %s31_s28, 0  ;;  %p42_p10 = scmp.eq.s32.totalorder %s4179_s12, 0 }
  0x46   : > { %p47_p11 = scmp.ne.s32.totalorder %s4171_s10, %s4167_s30  ;;  %p239_p13 = scmp.eq.s32.totalorder %s4269_s15, 1 }
  0x47   : > { %s4348_s13 = scalar_select %p32_p7, %s4175_s11, %s34_s29  }
  0x48   : > { %3859 = dma.hbm_to_vmem [thread:$0]  (!%p4283_p6), %s5101_s8, 2048, %s314_s20, [#allocation9], %s4187_s23, %s4187_s23, %s4188_s21  }
  0x49   : > { %p4350_p12 = por %p42_p10, %p41_p9  ;;  %p4356_p6 = por %p5088_p1, %p47_p11 }
  0x4a   : > { %p245_p0 = scmp.eq.s32.totalorder %s3278_s26, 1  ;;  %p3872_p2 = scmp.lt.s32.totalorder %s4179_s12, 2 }
  0x4b   : > { %s5103_s14 = scalar_select %p4356_p6, 1, 0 }
  0x4c   : > { %s327_s17 = sand.u32 1, %s4175_s11   ;;  %p4363_p5 = por %p239_p13, %p41_p9 }
  0x4d   : > { %p4367_p8 = por %p245_p0, %p47_p11  ;;  %s3285_s22 = sshll.u32 %s327_s17, 3 }
  0x4e   : > { %s5104_s18 = scalar_select %p4363_p5, 1, 0 }
  0x4f   : > { %s5105_s20 = scalar_select %p4367_p8, 1, 0 }
  0x50   : > { %s3286_s23 = sshll.u32 %s4179_s12, 7  ;;  %s331_s26 = scalar_lea.vmem [#allocation2], %s3285_s22 }
  0x51   : > { %s4375_s25 = scalar_lea.hbm %s5078_s0, %s3286_s23  ;;  %s338_s28 = sshll.u32 %s331_s26, 4  ;;  %s339_s28 = int_to_ptr.vmem [resolvable:$true] %s338_s28 }
  0x52   : > { %p4379_p7 = pnand %p3872_p2, %p4350_p12  ;;  %s328_s2 = scalar_lea.sflag [#allocation3], %s327_s17 }
  0x53   : > { %s4079_s4 = scalar_lea.hbm %s4375_s25, 128  ;;  %s4084_s24 = scalar_lea.hbm %s5078_s0, 256 }
  0x54   : > { %p4080_p9 = scmp.ne.s32.totalorder %s4375_s25, %s4079_s4  ;;  %p4081_p10 = pneg %p4379_p7 }
  0x55   : > { %p4085_p0 = scmp.lt.s32.totalorder %s4375_s25, %s5078_s0  ;;  %p4086_p12 = scmp.lt.s32.totalorder %s4084_s24, %s4079_s4 }
  0x56   : > { %p4082_p11 = pnand %p4081_p10, %p4080_p9 }
  0x57   : > { %p4087_p2 = por %p4086_p12, %p4085_p0 }
  0x58   : > { %p4083_p13 = pneg %p4082_p11 }
  0x5a   : > { %p4088_p4 = pnand %p4087_p2, %p4083_p13 }
  0x5c   : > { %4091 = shalt.err (!%p4088_p4)
}
  0x5d   : > { %s4092_s19 = scalar_lea.vmem %s339_s28, 128  ;;  %s4189_s17 = smov [#allocation2]  }
  0x5e   : > { %p4093_p1 = scmp.ne.s32.totalorder %s339_s28, %s4092_s19  ;;  %s4097_s5 = sshll.u32 %s4189_s17, 4  ;;  %s4098_s5 = int_to_ptr.vmem [resolvable:$false] %s4097_s5 }
  0x5f   : > { %s4099_s8 = scalar_lea.vmem %s4098_s5, 256  ;;  %p4100_p9 = scmp.lt.s32.totalorder %s339_s28, %s4098_s5 }
  0x60   : > { %p4095_p8 = pnand %p4093_p1, %p4081_p10  ;;  %p4101_p11 = scmp.lt.s32.totalorder %s4099_s8, %s4092_s19 }
  0x62   : > { %p4096_p5 = pneg %p4095_p8  ;;  %p4102_p6 = por %p4101_p11, %p4100_p9 }
  0x64   : > { %p4103_p3 = pnand %p4102_p6, %p4096_p5 }
  0x66   : > { %4106 = shalt.err (!%p4103_p3)
}
  0x67   : > { %3863 = dma.hbm_to_vmem [thread:$0]  (!%p4379_p7), %s4375_s25, 128, %s339_s28, %s328_s2  }
  0x68   : > { %p5107_p13 = scmp.ne.s32.totalorder %s5096_s16, 0 }
  0x69   : > { %s4400_s4 = sand.u32 (!%p5107_p13), 1, %s4171_s10   ;;  %p5108_p1 = scmp.ne.s32.totalorder (!%p5107_p13), %s5103_s14, 0 }
  0x6a   : > { %347 = sbr.rel (%p5107_p13) target bundleno = 5031 (0x13a7), region = 56  ;;  %s3288_s23 = sshll.u32 (!%p5107_p13), %s4400_s4, 3 }
  0x6b   : > { %s350_s21 = scalar_lea.sflag (!%p5107_p13), [#allocation3], %s4400_s4  ;;  %s353_s5 = scalar_lea.vmem (!%p5107_p13), [#allocation2], %s3288_s23 }
  0x6f   : > { %4150 = dma.done.wait (%p5108_p1), %s350_s21, 128  }
  0x70   : > { %4152 = vsyncadd (%p5108_p1), %s350_s21, 4294967168  ;;  %p5109_p3 = scmp.eq.s32.totalorder %s4269_s15, 0 }
  0x72   : > { %4154 = dma.done.wait (%p5109_p3), [#allocation6], 2176   ;;  %p5110_p4 = pmov %p5109_p3 }
  0x73   : > { %p5111_p6 = pmov %p5109_p3 }
  0x74   : > { %4156 = vsyncadd (%p5110_p4), [#allocation6], 4294965120 }
  0x75   : > { %4158 = dma.done.wait (%p5111_p6), [#allocation9], 4096   ;;  %p5112_p5 = pmov %p5109_p3 }
  0x76   : > { %v4416_v0 = vld [vmem:[%s353_s5] sm:$0xff]  ;;  %vm424_vm0 = vcmask 523264   ;;  %v4190_v3 = vmov 0.0   ;;  %v440_v4 = vld [vmem:[#allocation7 + $0x38] sm:$0xff]  ;;  %vm4191_vm1 = vmmov 0   ;;  %v437_v7 = vld [vmem:[#allocation7 + $0x20] sm:$0xff] }
  0x77   : > { %4160 = vsyncadd (%p5112_p5), [#allocation9], 4294963200  ;;  %v423_v1 = vmul.f32 %v4416_v0, %v4416_v0  ;;  %3513 = vmatprep.subr.mxu0 %v4190_v3  ;;  %v439_v5 = vld [vmem:[#allocation7 + $0x30] sm:$0xff]  ;;  %3532 = vmatprep.subr.mxu1 %v4190_v3  ;;  %v438_v6 = vld [vmem:[#allocation7 + $0x28] sm:$0xff]  ;;  %s4192_s25 = smov 64   ;;  %s4193_s28 = smov 112  }
  0x78   : > { %3514 = vmatpush3.msra.mxu0 %v440_v4  ;;  %3529 = vmatprep.mubr.msk.f32.mxu0 %vm4191_vm1, %v4190_v3  ;;  %v436_v8 = vld [vmem:[#allocation7 + $0x18] sm:$0xff]  ;;  %v435_v9 = vld [vmem:[#allocation7 + $0x10] sm:$0xff]  ;;  %v434_v10 = vld [vmem:[#allocation7 + $0x8] sm:$0xff]  ;;  %vm596_vm2 = vcmask 130048   ;;  %s4194_s29 = smov 96   ;;  %s4195_s24 = smov 80  }
  0x79   : > { %v425_v2 = vsel %vm424_vm0, %v423_v1, 0.0  ;;  %3515 = vmatprep.subr.mxu0 %v4190_v3  ;;  %3564 = vmatprep.mubr.msk.f32.mxu1 %vm4191_vm1, %v4190_v3  ;;  %v433_v11 = vld [vmem:[#allocation7] sm:$0xff]  ;;  %v4442_v13 = vld [vmem:[%s5081_s3 + $0x70] sm:$0xff]  ;;  %v4450_v14 = vld [vmem:[%s5081_s3 + $0x68] sm:$0xff]  ;;  %vm895_vm3 = vcmask 64512   ;;  %s4196_s22 = smov 32  }
  0x7a   : > { %426 = vadd.xlane.f32.xlu0 %v425_v2  ;;  %3516 = vmatpush3.msra.mxu0 %v439_v5  ;;  %v4437_v12 = vld [vmem:[%s5081_s3 + $0x78] sm:$0xff]  ;;  %v4457_v15 = vld [vmem:[%s5081_s3 + $0x60] sm:$0xff]  ;;  %v4471_v17 = vld [vmem:[%s5081_s3 + $0x50] sm:$0xff]  ;;  %s3370_s2 = sshll.u32 %s4269_s15, 8  ;;  %s3156_s26 = scalar_lea.sflag [#allocation4], %s4400_s4 }
  0x7b   : > { %3517 = vmatprep.subr.mxu0 %v4190_v3  ;;  %3533 = vmatpush3.msra.mxu1 %v4437_v12  ;;  %v4464_v16 = vld [vmem:[%s5081_s3 + $0x58] sm:$0xff]  ;;  %v4478_v18 = vld [vmem:[%s5081_s3 + $0x48] sm:$0xff]  ;;  %v4485_v19 = vld [vmem:[%s5081_s3 + $0x40] sm:$0xff]  ;;  %s3168_s14 = scalar_lea.hbm %s5087_s9, %s3370_s2  ;;  %p5113_p7 = scmp.ne.s32.totalorder %s5104_s18, 0 }
  0x7c   : > { %3518 = vmatpush3.msra.mxu0 %v438_v6  ;;  %3534 = vmatprep.subr.mxu1 %v4190_v3  ;;  %v4492_v20 = vld [vmem:[%s5081_s3 + $0x38] sm:$0xff]  ;;  %v4499_v21 = vld [vmem:[%s5081_s3 + $0x30] sm:$0xff]  ;;  %v4506_v22 = vld [vmem:[%s5081_s3 + $0x28] sm:$0xff]  ;;  %s4197_s15 = smov [#allocation11]  }
  0x7d   : > { %3519 = vmatprep.subr.mxu0 %v4190_v3  ;;  %3535 = vmatpush3.msra.mxu1 %v4442_v13  ;;  %v4513_v23 = vld [vmem:[%s5081_s3 + $0x20] sm:$0xff]  ;;  %v4520_v24 = vld [vmem:[%s5081_s3 + $0x18] sm:$0xff]  ;;  %v4527_v25 = vld [vmem:[%s5081_s3 + $0x10] sm:$0xff]  ;;  %s4111_s17 = sshll.u32 %s4197_s15, 4  ;;  %s4112_s17 = int_to_ptr.vmem [resolvable:$false] %s4111_s17 }
  0x7e   : > { %3520 = vmatpush3.msra.mxu0 %v437_v7  ;;  %3536 = vmatprep.subr.mxu1 %v4190_v3  ;;  %v4534_v26 = vld [vmem:[%s5081_s3 + $0x8] sm:$0xff]  ;;  %v4547_v32 = vld [vmem:[%s5081_s3] sm:$0xff]  ;;  %v4558_v36 = vld [vmem:[#allocation5] sm:$0xff]  ;;  %s4113_s23 = scalar_lea.vmem %s4112_s17, 512 }
  0x7f   : > { %3521 = vmatprep.subr.mxu0 %v4190_v3  ;;  %3537 = vmatpush3.msra.mxu1 %v4450_v14  ;;  %v4556_v35 = vld [vmem:[%s5079_s1] sm:$0xff] }
  0x80   : > { %3522 = vmatpush3.msra.mxu0 %v436_v8  ;;  %3538 = vmatprep.subr.mxu1 %v4190_v3 }
  0x81   : > { %3523 = vmatprep.subr.mxu0 %v4190_v3  ;;  %3539 = vmatpush3.msra.mxu1 %v4457_v15 }
  0x82   : > { %3524 = vmatpush3.msra.mxu0 %v435_v9  ;;  %3540 = vmatprep.subr.mxu1 %v4190_v3 }
  0x83   : > { %3525 = vmatprep.subr.mxu0 %v4190_v3  ;;  %3541 = vmatpush3.msra.mxu1 %v4464_v16 }
  0x84   : > { %3526 = vmatpush3.msra.mxu0 %v434_v10  ;;  %3542 = vmatprep.subr.mxu1 %v4190_v3 }
  0x85   : > { %3527 = vmatprep.subr.mxu0 %v4190_v3  ;;  %3543 = vmatpush3.msra.mxu1 %v4471_v17 }
  0x86   : > { %3528 = vmatpush3.msra.mxu0 %v433_v11  ;;  %3544 = vmatprep.subr.mxu1 %v4190_v3 }
  0x87   : > { %3567 = vmatprep.subr.mxu0 %v4190_v3  ;;  %3545 = vmatpush3.msra.mxu1 %v4478_v18 }
  0x88   : > { %3546 = vmatprep.subr.mxu1 %v4190_v3 }
  0x89   : > { %3547 = vmatpush3.msra.mxu1 %v4485_v19 }
  0x8a   : > { %3548 = vmatprep.subr.mxu1 %v4190_v3 }
  0x8b   : > { %3549 = vmatpush3.msra.mxu1 %v4492_v20 }
  0x8c   : > { %3550 = vmatprep.subr.mxu1 %v4190_v3 }
  0x8d   : > { %3551 = vmatpush3.msra.mxu1 %v4499_v21 }
  0x8e   : > { %3552 = vmatprep.subr.mxu1 %v4190_v3 }
  0x8f   : > { %3553 = vmatpush3.msra.mxu1 %v4506_v22 }
  0x90   : > { %3554 = vmatprep.subr.mxu1 %v4190_v3 }
  0x91   : > { %3555 = vmatpush3.msra.mxu1 %v4513_v23 }
  0x92   : > { %3556 = vmatprep.subr.mxu1 %v4190_v3 }
  0x93   : > { %3557 = vmatpush3.msra.mxu1 %v4520_v24 }
  0x94   : > { %3558 = vmatprep.subr.mxu1 %v4190_v3 }
  0x95   : > { %3559 = vmatpush3.msra.mxu1 %v4527_v25 }
  0x96   : > { %3560 = vmatprep.subr.mxu1 %v4190_v3 }
  0x97   : > { %3561 = vmatpush3.msra.mxu1 %v4534_v26 }
  0x98   : > { %3562 = vmatprep.subr.mxu1 %v4190_v3 }
  0x99   : > { %3563 = vmatpush3.msra.mxu1 %v4547_v32 }
  0x9a   : > { %3592 = vmatprep.subr.mxu1 %v4190_v3 }
 0x103   : > { %v427_v27 = vpop.xlane.xlu0 %426 }
 0x104   : > { %v429_v28 = vmul.f32 0.015625, %v427_v27 }
 0x106   : > { %v430_v29 = vadd.f32 1e-05, %v429_v28 }
 0x108   : > { %3925 = vrsqrt.f32 %v430_v29 }
 0x115   : > { %v3926_v30 = vpop.eup %3925 }
 0x116   : > { %v432_v31 = vmul.f32 %v3926_v30, %v4416_v0 }
 0x118   : > { %3530 = vmatmul.mubr.msk.f32.vlgmr.msra.gmra.mxu0 %vm424_vm0, %v432_v31 }
 0x119   : > { %3569 = vmatprep.mubr.msk.f32.mxu0 %vm4191_vm1, %v4190_v3 }
 0x1d8   : > { %v510_v33 = vpop.f32.mrf.mxu0 }
 0x1d9   : > { %3565 = vmatmul.mubr.f32.vlgmr.msra.gmra.mxu1 %v510_v33  ;;  %v514_v38 = vmul.f32 %v510_v33, %v4556_v35 }
 0x1da   : > { %v3531_v34 = vpop.f32.mrf.mxu0  ;;  %3594 = vmatprep.mubr.msk.f32.mxu1 %vm4191_vm1, %v4190_v3 }
 0x299   : > { %v581_v37 = vpop.f32.mrf.mxu1 }
 0x29a   : > { %v585_v39 = vmul.f32 %v581_v37, %v4558_v36 }
 0x29b   : > { %v3566_v40 = vpop.f32.mrf.mxu1 }
 0x29c   : > { %v4562_v41 = vadd.f32 %v585_v39, %v514_v38 }
 0x29e   : > { %594 = vrot.lane.b32.xlu1 %v4562_v41, %s4192_s25  ;;  %588 = vrot.lane.b32.xlu0 %v4562_v41, %s4193_s28 }
 0x310   : > { %v595_v42 = vpop.permute.xlu1 %594  ;;  %v4568_v43 = vpop.permute.xlu0 %588 }
 0x311   : > { %3568 = vmatpush3.xpose.msk.msra.mxu0 %vm596_vm2, %v595_v42  ;;  %743 = vrot.lane.b32.xlu1 %v4568_v43, %s4192_s25 }
 0x312   : > { %3572 = vmatprep.subr.mxu0 %v4190_v3 }
 0x314   : > { %3570 = vmatmul.mubr.msk.f32.vlgmr.msra.gmra.mxu0 %vm596_vm2, %v4562_v41 }
 0x315   : > { %3573 = vmatpush3.xpose.msk.msra.mxu0 %vm596_vm2, %v595_v42  ;;  %590 = vrot.lane.b32.xlu1 %v4562_v41, %s4194_s29 }
 0x316   : > { %3574 = vmatprep.mubr.msk.f32.mxu0 %vm4191_vm1, %v4190_v3  ;;  %3577 = vmatprep.subr.mxu0 %v4190_v3 }
 0x318   : > { %3575 = vmatmul.mubr.msk.f32.vlgmr.msra.gmra.mxu0 %vm596_vm2, %v4568_v43 }
 0x319   : > { %592 = vrot.lane.b32.xlu1 %v4562_v41, %s4195_s24  ;;  %3579 = vmatprep.mubr.msk.f32.mxu0 %vm4191_vm1, %v4190_v3 }
 0x383   : > { %v744_v44 = vpop.permute.xlu1 %743 }
 0x384   : > { %3578 = vmatpush3.xpose.msk.msra.mxu0 %vm596_vm2, %v744_v44 }
 0x385   : > { %3582 = vmatprep.subr.mxu0 %v4190_v3 }
 0x387   : > { %v591_v45 = vpop.permute.xlu1 %590 }
 0x388   : > { %3580 = vmatmul.mubr.msk.f32.vlgmr.msra.gmra.mxu0 %vm596_vm2, %v591_v45 }
 0x389   : > { %3583 = vmatpush3.xpose.msk.msra.mxu0 %vm596_vm2, %v744_v44  ;;  %3584 = vmatprep.mubr.msk.f32.mxu0 %vm4191_vm1, %v4190_v3 }
 0x38a   : > { %3587 = vmatprep.subr.mxu0 %v4190_v3 }
 0x38b   : > { %v593_v46 = vpop.permute.xlu1 %592 }
 0x38c   : > { %3585 = vmatmul.mubr.msk.f32.vlgmr.msra.gmra.mxu0 %vm596_vm2, %v593_v46 }
 0x38d   : > { %3589 = vmatprep.mubr.msk.f32.mxu0 %vm4191_vm1, %v4190_v3 }
 0x3d4   : > { %v667_v47 = vpop.f32.mrf.mxu0 }
 0x3d5   : > { %v891_v48 = vmul.f32 0.25, %v667_v47 }
 0x3d6   : > { %v3571_v49 = vpop.f32.mrf.mxu0 }
 0x3d7   : > { %v896_v50 = vsel %vm895_vm3, %v891_v48, -inf }
 0x3d8   : > { %897 = vmax.xlane.f32.xlu1 %v896_v50  ;;  %v739_v51 = vpop.f32.mrf.mxu0 }
 0x3d9   : > { %v892_v52 = vmul.f32 0.25, %v739_v51  ;;  %v1239_v51 = vld [vmem:[#allocation8 + $0x8] sm:$0xff] }
 0x3da   : > { %v3576_v53 = vpop.f32.mrf.mxu0 }
 0x3db   : > { %v899_v54 = vsel %vm895_vm3, %v892_v52, -inf }
 0x3dc   : > { %900 = vmax.xlane.f32.xlu0 %v899_v54  ;;  %v1241_v54 = vld [vmem:[#allocation8 + $0x18] sm:$0xff] }
 0x448   : > { %v815_v55 = vpop.f32.mrf.mxu0 }
 0x449   : > { %v893_v56 = vmul.f32 0.25, %v815_v55  ;;  %v1238_v55 = vld [vmem:[#allocation8] sm:$0xff] }
 0x44a   : > { %v3581_v57 = vpop.f32.mrf.mxu0 }
 0x44b   : > { %v902_v58 = vsel %vm895_vm3, %v893_v56, -inf  ;;  %v1243_v57 = vld [vmem:[#allocation8 + $0x28] sm:$0xff] }
 0x44c   : > { %903 = vmax.xlane.f32.xlu1 %v902_v58  ;;  %v887_v59 = vpop.f32.mrf.mxu0 }
 0x44d   : > { %v894_v60 = vmul.f32 0.25, %v887_v59 }
 0x44e   : > { %v3586_v61 = vpop.f32.mrf.mxu0 }
 0x44f   : > { %v905_v62 = vsel %vm895_vm3, %v894_v60, -inf  ;;  %v1242_v61 = vld [vmem:[#allocation8 + $0x20] sm:$0xff] }
 0x450   : > { %906 = vmax.xlane.f32.xlu1 %v905_v62 }
 0x461   : > { %v898_v63 = vpop.xlane.xlu1 %897 }
 0x462   : > { %v908_v1 = vsub.f32 %v891_v48, %v898_v63 }
 0x464   : > { %v912_v2 = vmul.f32 1.442695, %v908_v1  ;;  %v1244_v1 = vld [vmem:[#allocation8 + $0x30] sm:$0xff] }
 0x465   : > { %v901_v4 = vpop.xlane.xlu0 %900 }
 0x466   : > { %3927 = vpow2.f32 %v912_v2  ;;  %v909_v5 = vsub.f32 %v892_v52, %v901_v4 }
 0x468   : > { %v914_v6 = vmul.f32 1.442695, %v909_v5 }
 0x46a   : > { %3929 = vpow2.f32 %v914_v6 }
 0x473   : > { %v3928_v7 = vpop.eup %3927 }
 0x474   : > { %v920_v8 = vsel %vm895_vm3, %v3928_v7, 0.0 }
 0x475   : > { %921 = vadd.xlane.f32.xlu0 %v920_v8 }
 0x477   : > { %v3930_v9 = vpop.eup %3929 }
 0x478   : > { %v923_v10 = vsel %vm895_vm3, %v3930_v9, 0.0 }
 0x479   : > { %924 = vadd.xlane.f32.xlu1 %v923_v10 }
 0x4d5   : > { %v904_v11 = vpop.xlane.xlu1 %903 }
 0x4d6   : > { %v910_v27 = vsub.f32 %v893_v56, %v904_v11  ;;  %v1240_v56 = vld [vmem:[#allocation8 + $0x10] sm:$0xff] }
 0x4d8   : > { %v916_v28 = vmul.f32 1.442695, %v910_v27 }
 0x4d9   : > { %v907_v29 = vpop.xlane.xlu1 %906 }
 0x4da   : > { %3931 = vpow2.f32 %v916_v28  ;;  %v911_v30 = vsub.f32 %v894_v60, %v907_v29  ;;  %v1245_v60 = vld [vmem:[#allocation8 + $0x38] sm:$0xff] }
 0x4dc   : > { %v918_v31 = vmul.f32 1.442695, %v911_v30 }
 0x4de   : > { %3933 = vpow2.f32 %v918_v31 }
 0x4e7   : > { %v3932_v33 = vpop.eup %3931 }
 0x4e8   : > { %v926_v34 = vsel %vm895_vm3, %v3932_v33, 0.0 }
 0x4e9   : > { %927 = vadd.xlane.f32.xlu0 %v926_v34 }
 0x4eb   : > { %v3934_v37 = vpop.eup %3933 }
 0x4ec   : > { %v929_v38 = vsel %vm895_vm3, %v3934_v37, 0.0 }
 0x4ed   : > { %930 = vadd.xlane.f32.xlu1 %v929_v38 }
 0x4fe   : > { %1089 = vrot.lane.b32.xlu1 %v4568_v43, %s4196_s22  ;;  %v922_v39 = vpop.xlane.xlu0 %921 }
 0x4ff   : > { %940 = vrot.lane.b32.xlu0 %v4562_v41, %s4196_s22  ;;  %3935 = vrcp.f32 %v922_v39 }
 0x502   : > { %v925_v40 = vpop.xlane.xlu1 %924 }
 0x503   : > { %3937 = vrcp.f32 %v925_v40 }
 0x50c   : > { %v3936_v42 = vpop.eup %3935 }
 0x50d   : > { %v936_v48 = vmul.f32 %v3936_v42, %v3928_v7 }
 0x510   : > { %v3938_v45 = vpop.eup %3937 }
 0x511   : > { %v937_v49 = vmul.f32 %v3938_v45, %v3930_v9  ;;  %v1569_v45 = vld [vmem:[%s5084_s6 + $0x78] sm:$0xff] }
 0x572   : > { %v928_v44 = vpop.xlane.xlu0 %927 }
 0x573   : > { %3939 = vrcp.f32 %v928_v44 }
 0x576   : > { %v941_v46 = vpop.permute.xlu0 %940  ;;  %v931_v47 = vpop.xlane.xlu1 %930 }
 0x577   : > { %3941 = vrcp.f32 %v931_v47  ;;  %3588 = vmatpush3.msra.mxu0 %v941_v46  ;;  %3593 = vmatpush3.msra.mxu1 %v941_v46  ;;  %v1568_v46 = vld [vmem:[%s5084_s6 + $0x70] sm:$0xff]  ;;  %v1567_v47 = vld [vmem:[%s5084_s6 + $0x68] sm:$0xff] }
 0x578   : > { %3590 = vmatmul.mubr.msk.f32.vlgmr.msra.gmra.mxu0 %vm895_vm3, %v936_v48  ;;  %3595 = vmatmul.mubr.msk.f32.vlgmr.msra.gmra.mxu1 %vm895_vm3, %v937_v49  ;;  %v1565_v48 = vld [vmem:[%s5084_s6 + $0x58] sm:$0xff]  ;;  %v1564_v49 = vld [vmem:[%s5084_s6 + $0x50] sm:$0xff] }
 0x579   : > { %3597 = vmatprep.subr.mxu0 %v4190_v3  ;;  %3602 = vmatprep.subr.mxu1 %v4190_v3 }
 0x57a   : > { %v1090_v41 = vpop.permute.xlu1 %1089  ;;  %3599 = vmatprep.mubr.msk.f32.mxu0 %vm4191_vm1, %v4190_v3  ;;  %3604 = vmatprep.mubr.msk.f32.mxu1 %vm4191_vm1, %v4190_v3 }
 0x57b   : > { %3598 = vmatpush3.msra.mxu0 %v1090_v41  ;;  %3603 = vmatpush3.msra.mxu1 %v1090_v41  ;;  %v1563_v41 = vld [vmem:[%s5084_s6 + $0x48] sm:$0xff] }
 0x57c   : > { %3607 = vmatprep.subr.mxu0 %v4190_v3  ;;  %3614 = vmatprep.subr.mxu1 %v4190_v3 }
 0x580   : > { %v3940_v43 = vpop.eup %3939 }
 0x581   : > { %v938_v50 = vmul.f32 %v3940_v43, %v3932_v33  ;;  %v1562_v43 = vld [vmem:[%s5084_s6 + $0x40] sm:$0xff] }
 0x583   : > { %3600 = vmatmul.mubr.msk.f32.vlgmr.msra.gmra.mxu0 %vm895_vm3, %v938_v50  ;;  %v1561_v50 = vld [vmem:[%s5084_s6 + $0x38] sm:$0xff] }
 0x584   : > { %v3942_v52 = vpop.eup %3941  ;;  %3608 = vmatpush3.msra.mxu0 %v1239_v51  ;;  %3611 = vmatprep.mubr.msk.f32.mxu0 %vm4191_vm1, %v4190_v3  ;;  %v1560_v51 = vld [vmem:[%s5084_s6 + $0x30] sm:$0xff] }
 0x585   : > { %v939_v53 = vmul.f32 %v3942_v52, %v3934_v37  ;;  %3609 = vmatprep.subr.mxu0 %v4190_v3  ;;  %v1559_v52 = vld [vmem:[%s5084_s6 + $0x28] sm:$0xff] }
 0x586   : > { %3610 = vmatpush3.msra.mxu0 %v1238_v55  ;;  %v1556_v55 = vld [vmem:[%s5084_s6 + $0x10] sm:$0xff] }
 0x587   : > { %3605 = vmatmul.mubr.msk.f32.vlgmr.msra.gmra.mxu1 %vm895_vm3, %v939_v53  ;;  %3621 = vmatprep.subr.mxu0 %v4190_v3  ;;  %v1558_v53 = vld [vmem:[%s5084_s6 + $0x20] sm:$0xff] }
 0x588   : > { %3615 = vmatpush3.msra.mxu1 %v1241_v54  ;;  %3618 = vmatprep.mubr.msk.f32.mxu1 %vm4191_vm1, %v4190_v3  ;;  %v1557_v54 = vld [vmem:[%s5084_s6 + $0x18] sm:$0xff] }
 0x589   : > { %3616 = vmatprep.subr.mxu1 %v4190_v3 }
 0x58a   : > { %3617 = vmatpush3.msra.mxu1 %v1240_v56  ;;  %v1555_v56 = vld [vmem:[%s5084_s6 + $0x8] sm:$0xff] }
 0x58b   : > { %3628 = vmatprep.subr.mxu1 %v4190_v3 }
 0x638   : > { %v1012_v58 = vpop.f32.mrf.mxu0  ;;  %v1085_v59 = vpop.f32.mrf.mxu1 }
 0x639   : > { %3612 = vmatmul.mubr.msk.f32.vlgmr.msra.gmra.mxu0 %vm596_vm2, %v1012_v58  ;;  %3619 = vmatmul.mubr.msk.f32.vlgmr.msra.gmra.mxu1 %vm596_vm2, %v1085_v59 }
 0x63a   : > { %v3591_v62 = vpop.f32.mrf.mxu0  ;;  %v3596_v63 = vpop.f32.mrf.mxu1  ;;  %3622 = vmatpush3.msra.mxu0 %v1243_v57  ;;  %3625 = vmatprep.mubr.msk.f32.mxu0 %vm4191_vm1, %v4190_v3  ;;  %v1554_v57 = vld [vmem:[%s5084_s6] sm:$0xff] }
 0x63b   : > { %3623 = vmatprep.subr.mxu0 %v4190_v3  ;;  %3629 = vmatpush3.msra.mxu1 %v1245_v60  ;;  %v1667_v63 = vld [vmem:[%s5085_s7 + $0x78] sm:$0xff] }
 0x63c   : > { %3624 = vmatpush3.msra.mxu0 %v1242_v61  ;;  %3630 = vmatprep.subr.mxu1 %v4190_v3 }
 0x63d   : > { %3631 = vmatpush3.msra.mxu1 %v1244_v1  ;;  %3632 = vmatprep.mubr.msk.f32.mxu1 %vm4191_vm1, %v4190_v3  ;;  %v1666_v1 = vld [vmem:[%s5085_s7 + $0x70] sm:$0xff] }
 0x63e   : > { %3635 = vmatprep.subr.mxu1 %v4190_v3  ;;  %1589 = vmatprep.subr.mxu0 %v1569_v45 }
 0x643   : > { %v1161_v2 = vpop.f32.mrf.mxu0 }
 0x644   : > { %3626 = vmatmul.mubr.msk.f32.vlgmr.msra.gmra.mxu0 %vm596_vm2, %v1161_v2  ;;  %v1665_v2 = vld [vmem:[%s5085_s7 + $0x68] sm:$0xff] }
 0x645   : > { %v3601_v4 = vpop.f32.mrf.mxu0  ;;  %1637 = vmatprep.mubr.f32.mxu0 %v4190_v3  ;;  %1590 = vmatpush1.msra.mxu0 %v1568_v46 }
 0x646   : > { %1591 = vmatprep.subr.mxu0 %v1567_v47  ;;  %v1664_v4 = vld [vmem:[%s5085_s7 + $0x60] sm:$0xff] }
 0x647   : > { %v1234_v5 = vpop.f32.mrf.mxu1 }
 0x648   : > { %3633 = vmatmul.mubr.msk.f32.vlgmr.msra.gmra.mxu1 %vm596_vm2, %v1234_v5  ;;  %v1663_v5 = vld [vmem:[%s5085_s7 + $0x58] sm:$0xff] }
 0x649   : > { %v3606_v6 = vpop.f32.mrf.mxu1  ;;  %3667 = vmatprep.mubr.msk.f32.mxu1 %vm4191_vm1, %v4190_v3  ;;  %3636 = vmatpush3.msra.mxu1 %v1667_v63 }
 0x64a   : > { %3637 = vmatprep.subr.mxu1 %v4190_v3  ;;  %v1662_v6 = vld [vmem:[%s5085_s7 + $0x50] sm:$0xff] }
 0x64b   : > { %3638 = vmatpush3.msra.mxu1 %v1666_v1 }
 0x64c   : > { %3639 = vmatprep.subr.mxu1 %v4190_v3 }
 0x64d   : > { %3640 = vmatpush3.msra.mxu1 %v1665_v2 }
 0x64e   : > { %3641 = vmatprep.subr.mxu1 %v4190_v3 }
 0x64f   : > { %3642 = vmatpush3.msra.mxu1 %v1664_v4 }
 0x650   : > { %3643 = vmatprep.subr.mxu1 %v4190_v3 }
 0x651   : > { %3644 = vmatpush3.msra.mxu1 %v1663_v5 }
 0x652   : > { %3645 = vmatprep.subr.mxu1 %v4190_v3 }
 0x653   : > { %3646 = vmatpush3.msra.mxu1 %v1662_v6 }
 0x654   : > { %3647 = vmatprep.subr.mxu1 %v4190_v3 }
 0x6f9   : > { %v1315_v7 = vpop.f32.mrf.mxu0  ;;  %v1388_v8 = vpop.f32.mrf.mxu1 }
 0x6fa   : > { %v1538_v11 = vsel %vm424_vm0, %v1315_v7, 0.0  ;;  %v1539_v27 = vsel %vm424_vm0, %v1388_v8, 0.0  ;;  %v1661_v7 = vld [vmem:[%s5085_s7 + $0x48] sm:$0xff]  ;;  %v1660_v8 = vld [vmem:[%s5085_s7 + $0x40] sm:$0xff] }
 0x6fb   : > { %v3613_v9 = vpop.f32.mrf.mxu0  ;;  %v3620_v10 = vpop.f32.mrf.mxu1  ;;  %v1540_v30 = vadd.f32 %v1539_v27, %v1538_v11  ;;  %3648 = vmatpush3.msra.mxu1 %v1661_v7  ;;  %v1657_v11 = vld [vmem:[%s5085_s7 + $0x28] sm:$0xff]  ;;  %v1656_v27 = vld [vmem:[%s5085_s7 + $0x20] sm:$0xff] }
 0x6fc   : > { %3649 = vmatprep.subr.mxu1 %v4190_v3  ;;  %v1659_v9 = vld [vmem:[%s5085_s7 + $0x38] sm:$0xff]  ;;  %v1658_v10 = vld [vmem:[%s5085_s7 + $0x30] sm:$0xff] }
 0x6fd   : > { %3650 = vmatpush3.msra.mxu1 %v1660_v8 }
 0x6fe   : > { %3651 = vmatprep.subr.mxu1 %v4190_v3 }
 0x6ff   : > { %3652 = vmatpush3.msra.mxu1 %v1659_v9 }
 0x700   : > { %3653 = vmatprep.subr.mxu1 %v4190_v3 }
 0x701   : > { %3654 = vmatpush3.msra.mxu1 %v1658_v10 }
 0x702   : > { %3655 = vmatprep.subr.mxu1 %v4190_v3 }
 0x703   : > { %3656 = vmatpush3.msra.mxu1 %v1657_v11 }
 0x704   : > { %v1461_v28 = vpop.f32.mrf.mxu0  ;;  %3657 = vmatprep.subr.mxu1 %v4190_v3 }
 0x705   : > { %v1541_v29 = vsel %vm424_vm0, %v1461_v28, 0.0  ;;  %3658 = vmatpush3.msra.mxu1 %v1656_v27  ;;  %v1655_v28 = vld [vmem:[%s5085_s7 + $0x18] sm:$0xff] }
 0x706   : > { %v3627_v31 = vpop.f32.mrf.mxu0  ;;  %v1542_v33 = vadd.f32 %v1541_v29, %v1540_v30  ;;  %3659 = vmatprep.subr.mxu1 %v4190_v3  ;;  %v1654_v29 = vld [vmem:[%s5085_s7 + $0x10] sm:$0xff]  ;;  %v1653_v30 = vld [vmem:[%s5085_s7 + $0x8] sm:$0xff] }
 0x707   : > { %3660 = vmatpush3.msra.mxu1 %v1655_v28  ;;  %v1652_v31 = vld [vmem:[%s5085_s7] sm:$0xff] }
 0x708   : > { %v1534_v34 = vpop.f32.mrf.mxu1  ;;  %3661 = vmatprep.subr.mxu1 %v4190_v3 }
 0x709   : > { %v1543_v37 = vsel %vm424_vm0, %v1534_v34, 0.0  ;;  %3662 = vmatpush3.msra.mxu1 %v1654_v29 }
 0x70a   : > { %v1544_v38 = vadd.f32 %v1543_v37, %v1542_v33  ;;  %v3634_v39 = vpop.f32.mrf.mxu1  ;;  %3663 = vmatprep.subr.mxu1 %v4190_v3 }
 0x70b   : > { %3664 = vmatpush3.msra.mxu1 %v1653_v30 }
 0x70c   : > { %v4649_v40 = vadd.f32 %v1544_v38, %v4416_v0  ;;  %v1566_v0 = vld [vmem:[%s5084_s6 + $0x60] sm:$0xff]  ;;  %3665 = vmatprep.subr.mxu1 %v4190_v3 }
 0x70d   : > { %1592 = vmatpush1.msra.mxu0 %v1566_v0  ;;  %3666 = vmatpush3.msra.mxu1 %v1652_v31 }
 0x70e   : > { %v1546_v42 = vmul.f32 %v4649_v40, %v4649_v40  ;;  %1593 = vmatprep.subr.mxu0 %v1565_v48  ;;  %3724 = vmatprep.subr.mxu1 %v4190_v3 }
 0x70f   : > { %1594 = vmatpush1.msra.mxu0 %v1564_v49 }
 0x710   : > { %v1547_v44 = vsel %vm424_vm0, %v1546_v42, 0.0  ;;  %1595 = vmatprep.subr.mxu0 %v1563_v41  ;;  %v1755_v41 = vld [vmem:[#allocation7 + $0x78] sm:$0xff] }
 0x711   : > { %1548 = vadd.xlane.f32.xlu1 %v1547_v44  ;;  %1596 = vmatpush1.msra.mxu0 %v1562_v43  ;;  %v1754_v43 = vld [vmem:[#allocation7 + $0x70] sm:$0xff] }
 0x712   : > { %1597 = vmatprep.subr.mxu0 %v1561_v50  ;;  %v1753_v50 = vld [vmem:[#allocation7 + $0x68] sm:$0xff] }
 0x713   : > { %1598 = vmatpush1.msra.mxu0 %v1560_v51  ;;  %v1752_v51 = vld [vmem:[#allocation7 + $0x60] sm:$0xff] }
 0x714   : > { %1599 = vmatprep.subr.mxu0 %v1559_v52  ;;  %v1750_v52 = vld [vmem:[#allocation7 + $0x50] sm:$0xff] }
 0x715   : > { %1600 = vmatpush1.msra.mxu0 %v1558_v53  ;;  %v1749_v53 = vld [vmem:[#allocation7 + $0x48] sm:$0xff] }
 0x716   : > { %1601 = vmatprep.subr.mxu0 %v1557_v54  ;;  %v1748_v54 = vld [vmem:[#allocation7 + $0x40] sm:$0xff] }
 0x717   : > { %1602 = vmatpush1.msra.mxu0 %v1556_v55 }
 0x718   : > { %1603 = vmatprep.subr.mxu0 %v1555_v56 }
 0x719   : > { %1604 = vmatpush1.msra.mxu0 %v1554_v57 }
 0x71a   : > { %3670 = vmatprep.subr.mxu0 %v4190_v3 }
 0x79a   : > { %v1549_v58 = vpop.xlane.xlu1 %1548 }
 0x79b   : > { %v1550_v59 = vmul.f32 0.015625, %v1549_v58 }
 0x79d   : > { %v1551_v60 = vadd.f32 1e-05, %v1550_v59 }
 0x79f   : > { %3943 = vrsqrt.f32 %v1551_v60 }
 0x7ac   : > { %v3944_v61 = vpop.eup %3943 }
 0x7ad   : > { %v1553_v62 = vmul.f32 %v3944_v61, %v4649_v40 }
 0x7af   : > { %3311 = vmatmul.mubr.msk.f32.vlgmr.msra.gmra.mxu0 %vm424_vm0, %v1553_v62 }
 0x7b0   : > { %3686 = vmatprep.mubr.msk.f32.mxu0 %vm4191_vm1, %v4190_v3  ;;  %3671 = vmatpush3.msra.mxu0 %v1755_v41 }
 0x7b1   : > { %3672 = vmatprep.subr.mxu0 %v4190_v3 }
 0x7b2   : > { %3673 = vmatpush3.msra.mxu0 %v1754_v43 }
 0x7b3   : > { %3674 = vmatprep.subr.mxu0 %v4190_v3 }
 0x7b4   : > { %3675 = vmatpush3.msra.mxu0 %v1753_v50 }
 0x7b5   : > { %3676 = vmatprep.subr.mxu0 %v4190_v3 }
 0x7b6   : > { %3677 = vmatpush3.msra.mxu0 %v1752_v51 }
 0x7b7   : > { %3678 = vmatprep.subr.mxu0 %v4190_v3 }
 0x86f   : > { %v1639_v33 = vpop.f32.mrf.mxu0 }
 0x870   : > { %v3312_v34 = vmul.f32 -1.442695, %v1639_v33 }
 0x871   : > { %v1641_v44 = vpop.f32.mrf.mxu0 }
 0x872   : > { %3945 = vpow2.f32 %v3312_v34 }
 0x87f   : > { %v3946_v37 = vpop.eup %3945 }
 0x880   : > { %v1647_v38 = vadd.f32 1.0, %v3946_v37 }
 0x882   : > { %3947 = vrcp.f32 %v1647_v38 }
 0x88f   : > { %v3948_v39 = vpop.eup %3947 }
 0x890   : > { %v1650_v42 = vmul.f32 %v3948_v39, %v1639_v33 }
 0x892   : > { %v1651_v45 = vmul.f32 %v1650_v42, %v1641_v44 }
 0x894   : > { %3668 = vmatmul.mubr.f32.vlgmr.msra.gmra.mxu1 %v1651_v45 }
 0x895   : > { %3726 = vmatprep.mubr.msk.f32.mxu1 %vm4191_vm1, %v4190_v3 }
 0x954   : > { %v1734_v46 = vpop.f32.mrf.mxu1 }
 0x955   : > { %v4774_v47 = vadd.f32 %v1734_v46, %v4649_v40  ;;  %v1751_v40 = vld [vmem:[#allocation7 + $0x58] sm:$0xff] }
 0x956   : > { %v3669_v0 = vpop.f32.mrf.mxu1  ;;  %3679 = vmatpush3.msra.mxu0 %v1751_v40 }
 0x957   : > { %v1739_v48 = vmul.f32 %v4774_v47, %v4774_v47  ;;  %3680 = vmatprep.subr.mxu0 %v4190_v3 }
 0x958   : > { %3681 = vmatpush3.msra.mxu0 %v1750_v52 }
 0x959   : > { %v1740_v49 = vsel %vm424_vm0, %v1739_v48, 0.0  ;;  %3682 = vmatprep.subr.mxu0 %v4190_v3 }
 0x95a   : > { %1741 = vadd.xlane.f32.xlu0 %v1740_v49  ;;  %3683 = vmatpush3.msra.mxu0 %v1749_v53  ;;  %v2553_v49 = vld [vmem:[#allocation8 + $0x48] sm:$0xff] }
 0x95b   : > { %3684 = vmatprep.subr.mxu0 %v4190_v3 }
 0x95c   : > { %3685 = vmatpush3.msra.mxu0 %v1748_v54 }
 0x95d   : > { %3689 = vmatprep.subr.mxu0 %v4190_v3 }
 0x9e3   : > { %v1742_v55 = vpop.xlane.xlu0 %1741 }
 0x9e4   : > { %v1743_v56 = vmul.f32 0.015625, %v1742_v55 }
 0x9e6   : > { %v1744_v57 = vadd.f32 1e-05, %v1743_v56 }
 0x9e8   : > { %3949 = vrsqrt.f32 %v1744_v57 }
 0x9f5   : > { %v3950_v58 = vpop.eup %3949 }
 0x9f6   : > { %v1746_v59 = vmul.f32 %v3950_v58, %v4774_v47 }
 0x9f8   : > { %3687 = vmatmul.mubr.msk.f32.vlgmr.msra.gmra.mxu0 %vm424_vm0, %v1746_v59 }
 0x9f9   : > { %3690 = vmatpush3.msra.mxu0 %v4437_v12  ;;  %3721 = vmatprep.mubr.msk.f32.mxu0 %vm4191_vm1, %v4190_v3 }
 0x9fa   : > { %3691 = vmatprep.subr.mxu0 %v4190_v3 }
 0x9fb   : > { %3692 = vmatpush3.msra.mxu0 %v4442_v13 }
 0x9fc   : > { %3693 = vmatprep.subr.mxu0 %v4190_v3 }
 0x9fd   : > { %3694 = vmatpush3.msra.mxu0 %v4450_v14 }
 0x9fe   : > { %3695 = vmatprep.subr.mxu0 %v4190_v3 }
 0x9ff   : > { %3696 = vmatpush3.msra.mxu0 %v4457_v15 }
 0xa00   : > { %3697 = vmatprep.subr.mxu0 %v4190_v3 }
 0xa01   : > { %3698 = vmatpush3.msra.mxu0 %v4464_v16 }
 0xa02   : > { %3699 = vmatprep.subr.mxu0 %v4190_v3 }
 0xa03   : > { %3700 = vmatpush3.msra.mxu0 %v4471_v17 }
 0xa04   : > { %3701 = vmatprep.subr.mxu0 %v4190_v3 }
 0xa05   : > { %3702 = vmatpush3.msra.mxu0 %v4478_v18 }
 0xa06   : > { %3703 = vmatprep.subr.mxu0 %v4190_v3 }
 0xa07   : > { %3704 = vmatpush3.msra.mxu0 %v4485_v19 }
 0xa08   : > { %3705 = vmatprep.subr.mxu0 %v4190_v3 }
 0xa09   : > { %3706 = vmatpush3.msra.mxu0 %v4492_v20 }
 0xa0a   : > { %3707 = vmatprep.subr.mxu0 %v4190_v3 }
 0xa0b   : > { %3708 = vmatpush3.msra.mxu0 %v4499_v21 }
 0xa0c   : > { %3709 = vmatprep.subr.mxu0 %v4190_v3 }
 0xa0d   : > { %3710 = vmatpush3.msra.mxu0 %v4506_v22 }
 0xa0e   : > { %3711 = vmatprep.subr.mxu0 %v4190_v3 }
 0xa0f   : > { %3712 = vmatpush3.msra.mxu0 %v4513_v23 }
 0xa10   : > { %3713 = vmatprep.subr.mxu0 %v4190_v3 }
 0xa11   : > { %3714 = vmatpush3.msra.mxu0 %v4520_v24 }
 0xa12   : > { %3715 = vmatprep.subr.mxu0 %v4190_v3 }
 0xa13   : > { %3716 = vmatpush3.msra.mxu0 %v4527_v25 }
 0xa14   : > { %3717 = vmatprep.subr.mxu0 %v4190_v3 }
 0xa15   : > { %3718 = vmatpush3.msra.mxu0 %v4534_v26 }
 0xa16   : > { %3719 = vmatprep.subr.mxu0 %v4190_v3 }
 0xa17   : > { %3720 = vmatpush3.msra.mxu0 %v4547_v32 }
 0xa18   : > { %3764 = vmatprep.subr.mxu0 %v4190_v3 }
 0xab8   : > { %v1825_v12 = vpop.f32.mrf.mxu0 }
 0xab9   : > { %3722 = vmatmul.mubr.f32.vlgmr.msra.gmra.mxu0 %v1825_v12  ;;  %v1829_v15 = vmul.f32 %v1825_v12, %v4556_v35 }
 0xaba   : > { %v3688_v13 = vpop.f32.mrf.mxu0  ;;  %3768 = vmatprep.mubr.msk.f32.mxu0 %vm4191_vm1, %v4190_v3  ;;  %3765 = vmatpush3.msra.mxu0 %v2553_v49  ;;  %v3330_v49 = vld [vmem:[%s5084_s6 + $0x80] sm:$0xff] }
 0xabb   : > { %3766 = vmatprep.subr.mxu0 %v4190_v3  ;;  %v2552_v13 = vld [vmem:[#allocation8 + $0x40] sm:$0xff] }
 0xabc   : > { %3767 = vmatpush3.msra.mxu0 %v2552_v13  ;;  %v3354_v13 = vld [vmem:[%s5085_s7 + $0xb0] sm:$0xff] }
 0xabd   : > { %3778 = vmatprep.subr.mxu0 %v4190_v3 }
 0xb79   : > { %v1896_v14 = vpop.f32.mrf.mxu0 }
 0xb7a   : > { %v1900_v16 = vmul.f32 %v1896_v14, %v4558_v36  ;;  %v2555_v14 = vld [vmem:[#allocation8 + $0x58] sm:$0xff] }
 0xb7b   : > { %v3723_v17 = vpop.f32.mrf.mxu0 }
 0xb7c   : > { %v4827_v18 = vadd.f32 %v1900_v16, %v1829_v15  ;;  %v2554_v15 = vld [vmem:[#allocation8 + $0x50] sm:$0xff]  ;;  %v2557_v16 = vld [vmem:[#allocation8 + $0x68] sm:$0xff] }
 0xb7e   : > { %1909 = vrot.lane.b32.xlu1 %v4827_v18, %s4192_s25  ;;  %1903 = vrot.lane.b32.xlu0 %v4827_v18, %s4193_s28 }
 0xb82   : > { %1905 = vrot.lane.b32.xlu0 %v4827_v18, %s4194_s29 }
 0xbf0   : > { %v1910_v19 = vpop.permute.xlu1 %1909  ;;  %v4835_v20 = vpop.permute.xlu0 %1903 }
 0xbf1   : > { %3725 = vmatpush3.xpose.msk.msra.mxu1 %vm596_vm2, %v1910_v19  ;;  %2057 = vrot.lane.b32.xlu1 %v4835_v20, %s4192_s25 }
 0xbf2   : > { %3729 = vmatprep.subr.mxu1 %v4190_v3 }
 0xbf4   : > { %3727 = vmatmul.mubr.msk.f32.vlgmr.msra.gmra.mxu1 %vm596_vm2, %v4827_v18  ;;  %v1906_v22 = vpop.permute.xlu0 %1905 }
 0xbf5   : > { %3730 = vmatpush3.xpose.msk.msra.mxu1 %vm596_vm2, %v1910_v19  ;;  %1907 = vrot.lane.b32.xlu1 %v4827_v18, %s4195_s24 }
 0xbf6   : > { %3731 = vmatprep.mubr.msk.f32.mxu1 %vm4191_vm1, %v4190_v3  ;;  %3734 = vmatprep.subr.mxu1 %v4190_v3 }
 0xbf8   : > { %3732 = vmatmul.mubr.msk.f32.vlgmr.msra.gmra.mxu1 %vm596_vm2, %v4835_v20 }
 0xbf9   : > { %3736 = vmatprep.mubr.msk.f32.mxu1 %vm4191_vm1, %v4190_v3 }
 0xc63   : > { %v2058_v21 = vpop.permute.xlu1 %2057 }
 0xc64   : > { %3735 = vmatpush3.xpose.msk.msra.mxu1 %vm596_vm2, %v2058_v21 }
 0xc65   : > { %3739 = vmatprep.subr.mxu1 %v4190_v3 }
 0xc67   : > { %3737 = vmatmul.mubr.msk.f32.vlgmr.msra.gmra.mxu1 %vm596_vm2, %v1906_v22  ;;  %v1908_v23 = vpop.permute.xlu1 %1907  ;;  %v2558_v22 = vld [vmem:[#allocation8 + $0x70] sm:$0xff] }
 0xc68   : > { %3740 = vmatpush3.xpose.msk.msra.mxu1 %vm596_vm2, %v2058_v21  ;;  %3741 = vmatprep.mubr.msk.f32.mxu1 %vm4191_vm1, %v4190_v3 }
 0xc69   : > { %3744 = vmatprep.subr.mxu1 %v4190_v3 }
 0xc6b   : > { %3742 = vmatmul.mubr.msk.f32.vlgmr.msra.gmra.mxu1 %vm596_vm2, %v1908_v23 }
 0xc6c   : > { %3746 = vmatprep.mubr.msk.f32.mxu1 %vm4191_vm1, %v4190_v3 }
 0xcb4   : > { %v1981_v24 = vpop.f32.mrf.mxu1 }
 0xcb5   : > { %v2205_v25 = vmul.f32 0.25, %v1981_v24 }
 0xcb6   : > { %v3728_v26 = vpop.f32.mrf.mxu1 }
 0xcb7   : > { %v2209_v32 = vsel %vm895_vm3, %v2205_v25, -inf }
 0xcb8   : > { %2210 = vmax.xlane.f32.xlu0 %v2209_v32  ;;  %v2053_v35 = vpop.f32.mrf.mxu1 }
 0xcb9   : > { %v2206_v36 = vmul.f32 0.25, %v2053_v35 }
 0xcba   : > { %v3733_v60 = vpop.f32.mrf.mxu1 }
 0xcbb   : > { %v2212_v61 = vsel %vm895_vm3, %v2206_v36, -inf }
 0xcbc   : > { %2213 = vmax.xlane.f32.xlu1 %v2212_v61 }
 0xd27   : > { %v2129_v62 = vpop.f32.mrf.mxu1 }
 0xd28   : > { %v2207_v63 = vmul.f32 0.25, %v2129_v62 }
 0xd29   : > { %v3738_v1 = vpop.f32.mrf.mxu1 }
 0xd2a   : > { %v2215_v2 = vsel %vm895_vm3, %v2207_v63, -inf }
 0xd2b   : > { %2216 = vmax.xlane.f32.xlu0 %v2215_v2  ;;  %v2201_v4 = vpop.f32.mrf.mxu1 }
 0xd2c   : > { %v2208_v5 = vmul.f32 0.25, %v2201_v4 }
 0xd2d   : > { %v3743_v6 = vpop.f32.mrf.mxu1 }
 0xd2e   : > { %v2218_v7 = vsel %vm895_vm3, %v2208_v5, -inf }
 0xd2f   : > { %2219 = vmax.xlane.f32.xlu0 %v2218_v7 }
 0xd41   : > { %v2211_v8 = vpop.xlane.xlu0 %2210 }
 0xd42   : > { %v2221_v9 = vsub.f32 %v2205_v25, %v2211_v8 }
 0xd44   : > { %v2225_v10 = vmul.f32 1.442695, %v2221_v9 }
 0xd45   : > { %v2214_v11 = vpop.xlane.xlu1 %2213 }
 0xd46   : > { %3951 = vpow2.f32 %v2225_v10  ;;  %v2222_v27 = vsub.f32 %v2206_v36, %v2214_v11 }
 0xd48   : > { %v2227_v28 = vmul.f32 1.442695, %v2222_v27 }
 0xd4a   : > { %3953 = vpow2.f32 %v2227_v28 }
 0xd53   : > { %v3952_v29 = vpop.eup %3951 }
 0xd54   : > { %v2233_v30 = vsel %vm895_vm3, %v3952_v29, 0.0 }
 0xd55   : > { %2234 = vadd.xlane.f32.xlu1 %v2233_v30  ;;  %v3344_v30 = vld [vmem:[%s5084_s6 + $0xf0] sm:$0xff] }
 0xd57   : > { %v3954_v31 = vpop.eup %3953 }
 0xd58   : > { %v2236_v33 = vsel %vm895_vm3, %v3954_v31, 0.0 }
 0xd59   : > { %2237 = vadd.xlane.f32.xlu0 %v2236_v33  ;;  %v3341_v33 = vld [vmem:[%s5084_s6 + $0xd8] sm:$0xff] }
 0xdb4   : > { %v2217_v34 = vpop.xlane.xlu0 %2216 }
 0xdb5   : > { %v2223_v37 = vsub.f32 %v2207_v63, %v2217_v34  ;;  %v3340_v34 = vld [vmem:[%s5084_s6 + $0xd0] sm:$0xff] }
 0xdb7   : > { %v2229_v38 = vmul.f32 1.442695, %v2223_v37  ;;  %v3339_v37 = vld [vmem:[%s5084_s6 + $0xc8] sm:$0xff] }
 0xdb8   : > { %v2220_v39 = vpop.xlane.xlu0 %2219 }
 0xdb9   : > { %3955 = vpow2.f32 %v2229_v38  ;;  %v2224_v42 = vsub.f32 %v2208_v5, %v2220_v39  ;;  %v3338_v38 = vld [vmem:[%s5084_s6 + $0xc0] sm:$0xff]  ;;  %v3337_v39 = vld [vmem:[%s5084_s6 + $0xb8] sm:$0xff] }
 0xdbb   : > { %v2231_v44 = vmul.f32 1.442695, %v2224_v42  ;;  %v3336_v42 = vld [vmem:[%s5084_s6 + $0xb0] sm:$0xff] }
 0xdbd   : > { %3957 = vpow2.f32 %v2231_v44  ;;  %v3335_v44 = vld [vmem:[%s5084_s6 + $0xa8] sm:$0xff] }
 0xdc6   : > { %v3956_v45 = vpop.eup %3955 }
 0xdc7   : > { %v2239_v46 = vsel %vm895_vm3, %v3956_v45, 0.0 }
 0xdc8   : > { %2240 = vadd.xlane.f32.xlu1 %v2239_v46  ;;  %v3333_v46 = vld [vmem:[%s5084_s6 + $0x98] sm:$0xff] }
 0xdca   : > { %v3958_v0 = vpop.eup %3957 }
 0xdcb   : > { %v2242_v48 = vsel %vm895_vm3, %v3958_v0, 0.0 }
 0xdcc   : > { %2243 = vadd.xlane.f32.xlu0 %v2242_v48  ;;  %v3331_v48 = vld [vmem:[%s5084_s6 + $0x88] sm:$0xff] }
 0xdd9   : > { %2253 = vrot.lane.b32.xlu1 %v4827_v18, %s4196_s22  ;;  %v2556_v18 = vld [vmem:[#allocation8 + $0x60] sm:$0xff] }
 0xdde   : > { %v2235_v41 = vpop.xlane.xlu1 %2234 }
 0xddf   : > { %3959 = vrcp.f32 %v2235_v41 }
 0xde2   : > { %2402 = vrot.lane.b32.xlu0 %v4835_v20, %s4196_s22  ;;  %v2238_v43 = vpop.xlane.xlu0 %2237  ;;  %v2559_v20 = vld [vmem:[#allocation8 + $0x78] sm:$0xff]  ;;  %s3293_s22 = sshll.u32 %s4400_s4, 4 }
 0xde3   : > { %3961 = vrcp.f32 %v2238_v43  ;;  %s403_s21 = scalar_lea.vmem [#allocation11], %s3293_s22 }
 0xde4   : > { %s3170_s5 = sshll.u32 %s403_s21, 4  ;;  %s5038_s5 = int_to_ptr.vmem [resolvable:$true] %s3170_s5 }
 0xde5   : > { %s4107_s19 = scalar_lea.vmem %s5038_s5, 256  ;;  %p4114_p12 = scmp.lt.s32.totalorder %s5038_s5, %s4112_s17 }
 0xde6   : > { %p4108_p8 = scmp.ne.s32.totalorder %s5038_s5, %s4107_s19  ;;  %p4115_p2 = scmp.lt.s32.totalorder %s4113_s23, %s4107_s19 }
 0xde8   : > { %p4109_p10 = pnand %p4108_p8, %p5113_p7  ;;  %p4116_p9 = por %p4115_p2, %p4114_p12 }
 0xdea   : > { %p4110_p0 = pneg %p4109_p10 }
 0xdec   : > { %v3960_v51 = vpop.eup %3959  ;;  %p4117_p11 = pnand %p4116_p9, %p4110_p0 }
 0xded   : > { %v2249_v53 = vmul.f32 %v3960_v51, %v3952_v29  ;;  %v3345_v29 = vld [vmem:[%s5084_s6 + $0xf8] sm:$0xff] }
 0xdf0   : > { %v3962_v54 = vpop.eup %3961 }
 0xdf1   : > { %v2250_v56 = vmul.f32 %v3962_v54, %v3954_v31  ;;  %v3343_v31 = vld [vmem:[%s5084_s6 + $0xe8] sm:$0xff] }
 0xdf2   : > { %v3361_v54 = vld [vmem:[%s5085_s7 + $0xe8] sm:$0xff] }
 0xe51   : > { %v2241_v50 = vpop.xlane.xlu1 %2240 }
 0xe52   : > { %3963 = vrcp.f32 %v2241_v50 }
 0xe55   : > { %v2254_v40 = vpop.permute.xlu1 %2253  ;;  %v2244_v52 = vpop.xlane.xlu0 %2243 }
 0xe56   : > { %3965 = vrcp.f32 %v2244_v52  ;;  %3745 = vmatpush3.msra.mxu1 %v2254_v40  ;;  %v3363_v52 = vld [vmem:[%s5085_s7 + $0xf8] sm:$0xff] }
 0xe57   : > { %3747 = vmatmul.mubr.msk.f32.vlgmr.msra.gmra.mxu1 %vm895_vm3, %v2249_v53  ;;  %3749 = vmatprep.subr.mxu1 %v4190_v3  ;;  %v3362_v53 = vld [vmem:[%s5085_s7 + $0xf0] sm:$0xff] }
 0xe58   : > { %3750 = vmatpush3.msra.mxu1 %v2254_v40  ;;  %3751 = vmatprep.mubr.msk.f32.mxu1 %vm4191_vm1, %v4190_v3 }
 0xe59   : > { %v2403_v55 = vpop.permute.xlu0 %2402  ;;  %3754 = vmatprep.subr.mxu1 %v4190_v3 }
 0xe5b   : > { %3752 = vmatmul.mubr.msk.f32.vlgmr.msra.gmra.mxu1 %vm895_vm3, %v2250_v56  ;;  %v3359_v56 = vld [vmem:[%s5085_s7 + $0xd8] sm:$0xff] }
 0xe5c   : > { %3755 = vmatpush3.msra.mxu1 %v2403_v55  ;;  %3756 = vmatprep.mubr.msk.f32.mxu1 %vm4191_vm1, %v4190_v3 }
 0xe5d   : > { %3759 = vmatprep.subr.mxu1 %v4190_v3 }
 0xe5f   : > { %v3964_v57 = vpop.eup %3963 }
 0xe60   : > { %v2251_v58 = vmul.f32 %v3964_v57, %v3956_v45  ;;  %v3334_v45 = vld [vmem:[%s5084_s6 + $0xa0] sm:$0xff]  ;;  %v3358_v57 = vld [vmem:[%s5085_s7 + $0xd0] sm:$0xff] }
 0xe62   : > { %3757 = vmatmul.mubr.msk.f32.vlgmr.msra.gmra.mxu1 %vm895_vm3, %v2251_v58  ;;  %v3357_v58 = vld [vmem:[%s5085_s7 + $0xc8] sm:$0xff] }
 0xe63   : > { %v3966_v59 = vpop.eup %3965  ;;  %3760 = vmatpush3.msra.mxu1 %v2403_v55  ;;  %3761 = vmatprep.mubr.msk.f32.mxu1 %vm4191_vm1, %v4190_v3  ;;  %v3360_v55 = vld [vmem:[%s5085_s7 + $0xe0] sm:$0xff] }
 0xe64   : > { %v2252_v12 = vmul.f32 %v3966_v59, %v3958_v0  ;;  %3771 = vmatprep.subr.mxu1 %v4190_v3  ;;  %v3332_v0 = vld [vmem:[%s5084_s6 + $0x90] sm:$0xff]  ;;  %v3356_v59 = vld [vmem:[%s5085_s7 + $0xc0] sm:$0xff] }
 0xe66   : > { %3762 = vmatmul.mubr.msk.f32.vlgmr.msra.gmra.mxu1 %vm895_vm3, %v2252_v12  ;;  %v3355_v12 = vld [vmem:[%s5085_s7 + $0xb8] sm:$0xff] }
 0xe67   : > { %3775 = vmatprep.mubr.msk.f32.mxu1 %vm4191_vm1, %v4190_v3  ;;  %3772 = vmatpush3.msra.mxu1 %v2555_v14  ;;  %v3353_v14 = vld [vmem:[%s5085_s7 + $0xa8] sm:$0xff] }
 0xe68   : > { %3773 = vmatprep.subr.mxu1 %v4190_v3 }
 0xe69   : > { %3774 = vmatpush3.msra.mxu1 %v2554_v15  ;;  %v3352_v15 = vld [vmem:[%s5085_s7 + $0xa0] sm:$0xff] }
 0xe6a   : > { %3785 = vmatprep.subr.mxu1 %v4190_v3 }
 0xf17   : > { %v2325_v17 = vpop.f32.mrf.mxu1 }
 0xf18   : > { %3769 = vmatmul.mubr.msk.f32.vlgmr.msra.gmra.mxu0 %vm596_vm2, %v2325_v17  ;;  %v3350_v17 = vld [vmem:[%s5085_s7 + $0x90] sm:$0xff] }
 0xf19   : > { %v3748_v19 = vpop.f32.mrf.mxu1  ;;  %3779 = vmatpush3.msra.mxu0 %v2557_v16  ;;  %3782 = vmatprep.mubr.msk.f32.mxu0 %vm4191_vm1, %v4190_v3  ;;  %v3351_v16 = vld [vmem:[%s5085_s7 + $0x98] sm:$0xff] }
 0xf1a   : > { %3780 = vmatprep.subr.mxu0 %v4190_v3  ;;  %v3348_v19 = vld [vmem:[%s5085_s7 + $0x80] sm:$0xff] }
 0xf1b   : > { %v2398_v21 = vpop.f32.mrf.mxu1  ;;  %3781 = vmatpush3.msra.mxu0 %v2556_v18  ;;  %v3349_v18 = vld [vmem:[%s5085_s7 + $0x88] sm:$0xff] }
 0xf1c   : > { %3776 = vmatmul.mubr.msk.f32.vlgmr.msra.gmra.mxu1 %vm596_vm2, %v2398_v21  ;;  %2904 = vmatprep.subr.mxu0 %v3345_v29  ;;  %v3064_v29 = vld [vmem:[#allocation10 + $0x8] sm:$0xff] }
 0xf1d   : > { %v3753_v23 = vpop.f32.mrf.mxu1  ;;  %3786 = vmatpush3.msra.mxu1 %v2559_v20  ;;  %3789 = vmatprep.mubr.msk.f32.mxu1 %vm4191_vm1, %v4190_v3 }
 0xf1e   : > { %3787 = vmatprep.subr.mxu1 %v4190_v3 }
 0xf1f   : > { %3788 = vmatpush3.msra.mxu1 %v2558_v22 }
 0xf20   : > { %3792 = vmatprep.subr.mxu1 %v4190_v3 }
 0xf22   : > { %v2474_v24 = vpop.f32.mrf.mxu1 }
 0xf23   : > { %3783 = vmatmul.mubr.msk.f32.vlgmr.msra.gmra.mxu0 %vm596_vm2, %v2474_v24 }
 0xf24   : > { %v3758_v25 = vpop.f32.mrf.mxu1  ;;  %2952 = vmatprep.mubr.f32.mxu0 %v4190_v3  ;;  %2905 = vmatpush1.msra.mxu0 %v3344_v30  ;;  %v3063_v30 = vld [vmem:[#allocation10] sm:$0xff] }
 0xf25   : > { %2906 = vmatprep.subr.mxu0 %v3343_v31 }
 0xf26   : > { %v2547_v26 = vpop.f32.mrf.mxu1 }
 0xf27   : > { %3790 = vmatmul.mubr.msk.f32.vlgmr.msra.gmra.mxu1 %vm596_vm2, %v2547_v26 }
 0xf28   : > { %v3763_v32 = vpop.f32.mrf.mxu1  ;;  %3824 = vmatprep.mubr.msk.f32.mxu1 %vm4191_vm1, %v4190_v3  ;;  %3793 = vmatpush3.msra.mxu1 %v3363_v52 }
 0xf29   : > { %3794 = vmatprep.subr.mxu1 %v4190_v3 }
 0xf2a   : > { %3795 = vmatpush3.msra.mxu1 %v3362_v53 }
 0xf2b   : > { %3796 = vmatprep.subr.mxu1 %v4190_v3 }
 0xf2c   : > { %3797 = vmatpush3.msra.mxu1 %v3361_v54 }
 0xf2d   : > { %3798 = vmatprep.subr.mxu1 %v4190_v3 }
 0xf2e   : > { %3799 = vmatpush3.msra.mxu1 %v3360_v55 }
 0xf2f   : > { %3800 = vmatprep.subr.mxu1 %v4190_v3 }
 0xf30   : > { %3801 = vmatpush3.msra.mxu1 %v3359_v56 }
 0xf31   : > { %3802 = vmatprep.subr.mxu1 %v4190_v3 }
 0xf32   : > { %3803 = vmatpush3.msra.mxu1 %v3358_v57 }
 0xf33   : > { %3804 = vmatprep.subr.mxu1 %v4190_v3 }
 0xf34   : > { %3805 = vmatpush3.msra.mxu1 %v3357_v58 }
 0xf35   : > { %3806 = vmatprep.subr.mxu1 %v4190_v3 }
 0xf36   : > { %3807 = vmatpush3.msra.mxu1 %v3356_v59 }
 0xf37   : > { %3808 = vmatprep.subr.mxu1 %v4190_v3 }
 0xf38   : > { %3809 = vmatpush3.msra.mxu1 %v3355_v12 }
 0xf39   : > { %3810 = vmatprep.subr.mxu1 %v4190_v3 }
 0xf3a   : > { %3811 = vmatpush3.msra.mxu1 %v3354_v13 }
 0xf3b   : > { %3812 = vmatprep.subr.mxu1 %v4190_v3 }
 0xf3c   : > { %3813 = vmatpush3.msra.mxu1 %v3353_v14 }
 0xf3d   : > { %3814 = vmatprep.subr.mxu1 %v4190_v3 }
 0xf3e   : > { %3815 = vmatpush3.msra.mxu1 %v3352_v15 }
 0xf3f   : > { %3816 = vmatprep.subr.mxu1 %v4190_v3 }
 0xf40   : > { %3817 = vmatpush3.msra.mxu1 %v3351_v16 }
 0xf41   : > { %3818 = vmatprep.subr.mxu1 %v4190_v3 }
 0xf42   : > { %3819 = vmatpush3.msra.mxu1 %v3350_v17 }
 0xf43   : > { %3820 = vmatprep.subr.mxu1 %v4190_v3 }
 0xf44   : > { %3821 = vmatpush3.msra.mxu1 %v3349_v18 }
 0xf45   : > { %3822 = vmatprep.subr.mxu1 %v4190_v3 }
 0xf46   : > { %3823 = vmatpush3.msra.mxu1 %v3348_v19 }
 0xfd8   : > { %v2629_v35 = vpop.f32.mrf.mxu0 }
 0xfd9   : > { %v2852_v1 = vsel %vm424_vm0, %v2629_v35, 0.0 }
 0xfda   : > { %v3770_v36 = vpop.f32.mrf.mxu0 }
 0xfdc   : > { %v2702_v60 = vpop.f32.mrf.mxu1 }
 0xfdd   : > { %v2853_v62 = vsel %vm424_vm0, %v2702_v60, 0.0 }
 0xfde   : > { %v3777_v61 = vpop.f32.mrf.mxu1  ;;  %v2854_v4 = vadd.f32 %v2853_v62, %v2852_v1  ;;  %v3076_v1 = vld [vmem:[#allocation10 + $0x68] sm:$0xff] }
 0xfe3   : > { %v2775_v63 = vpop.f32.mrf.mxu0 }
 0xfe4   : > { %v2855_v2 = vsel %vm424_vm0, %v2775_v63, 0.0  ;;  %v3077_v63 = vld [vmem:[#allocation10 + $0x70] sm:$0xff] }
 0xfe5   : > { %v3784_v5 = vpop.f32.mrf.mxu0  ;;  %v2856_v6 = vadd.f32 %v2855_v2, %v2854_v4  ;;  %v3075_v2 = vld [vmem:[#allocation10 + $0x60] sm:$0xff]  ;;  %v3074_v4 = vld [vmem:[#allocation10 + $0x58] sm:$0xff] }
 0xfe6   : > { %v3073_v5 = vld [vmem:[#allocation10 + $0x50] sm:$0xff] }
 0xfe7   : > { %v2848_v7 = vpop.f32.mrf.mxu1 }
 0xfe8   : > { %v2857_v8 = vsel %vm424_vm0, %v2848_v7, 0.0  ;;  %v3071_v7 = vld [vmem:[#allocation10 + $0x40] sm:$0xff] }
 0xfe9   : > { %v2858_v9 = vadd.f32 %v2857_v8, %v2856_v6  ;;  %v3791_v10 = vpop.f32.mrf.mxu1  ;;  %v3072_v6 = vld [vmem:[#allocation10 + $0x48] sm:$0xff]  ;;  %v3070_v8 = vld [vmem:[#allocation10 + $0x38] sm:$0xff] }
 0xfea   : > { %v3068_v10 = vld [vmem:[#allocation10 + $0x28] sm:$0xff] }
 0xfeb   : > { %v4914_v11 = vadd.f32 %v2858_v9, %v4774_v47  ;;  %v3342_v47 = vld [vmem:[%s5084_s6 + $0xe0] sm:$0xff]  ;;  %v3069_v9 = vld [vmem:[#allocation10 + $0x30] sm:$0xff] }
 0xfec   : > { %2907 = vmatpush1.msra.mxu0 %v3342_v47 }
 0xfed   : > { %v2860_v27 = vmul.f32 %v4914_v11, %v4914_v11  ;;  %2908 = vmatprep.subr.mxu0 %v3341_v33 }
 0xfee   : > { %2909 = vmatpush1.msra.mxu0 %v3340_v34 }
 0xfef   : > { %v2861_v28 = vsel %vm424_vm0, %v2860_v27, 0.0  ;;  %2910 = vmatprep.subr.mxu0 %v3339_v37  ;;  %v3066_v27 = vld [vmem:[#allocation10 + $0x18] sm:$0xff] }
 0xff0   : > { %2862 = vadd.xlane.f32.xlu1 %v2861_v28  ;;  %2911 = vmatpush1.msra.mxu0 %v3338_v38  ;;  %v3065_v28 = vld [vmem:[#allocation10 + $0x10] sm:$0xff] }
 0xff1   : > { %2912 = vmatprep.subr.mxu0 %v3337_v39 }
 0xff2   : > { %2913 = vmatpush1.msra.mxu0 %v3336_v42 }
 0xff3   : > { %2914 = vmatprep.subr.mxu0 %v3335_v44 }
 0xff4   : > { %2915 = vmatpush1.msra.mxu0 %v3334_v45 }
 0xff5   : > { %2916 = vmatprep.subr.mxu0 %v3333_v46 }
 0xff6   : > { %2917 = vmatpush1.msra.mxu0 %v3332_v0 }
 0xff7   : > { %2918 = vmatprep.subr.mxu0 %v3331_v48 }
 0xff8   : > { %2919 = vmatpush1.msra.mxu0 %v3330_v49 }
0x1079   : > { %v2863_v41 = vpop.xlane.xlu1 %2862 }
0x107a   : > { %v2864_v43 = vmul.f32 0.015625, %v2863_v41 }
0x107c   : > { %v2865_v50 = vadd.f32 1e-05, %v2864_v43 }
0x107e   : > { %3967 = vrsqrt.f32 %v2865_v50 }
0x108b   : > { %v3968_v51 = vpop.eup %3967 }
0x108c   : > { %v2867_v40 = vmul.f32 %v3968_v51, %v4914_v11 }
0x108e   : > { %3346 = vmatmul.mubr.msk.f32.vlgmr.msra.gmra.mxu0 %vm424_vm0, %v2867_v40 }
0x108f   : > { %3146 = vmatprep.mubr.f32.mxu0 %v4190_v3  ;;  %v3078_v3 = vld [vmem:[#allocation10 + $0x78] sm:$0xff] }
0x1090   : > { %3098 = vmatprep.subr.mxu0 %v3078_v3 }
0x1091   : > { %3099 = vmatpush1.msra.mxu0 %v3077_v63 }
0x1092   : > { %3100 = vmatprep.subr.mxu0 %v3076_v1 }
0x1093   : > { %3101 = vmatpush1.msra.mxu0 %v3075_v2 }
0x1094   : > { %3102 = vmatprep.subr.mxu0 %v3074_v4 }
0x1095   : > { %3103 = vmatpush1.msra.mxu0 %v3073_v5 }
0x1096   : > { %3104 = vmatprep.subr.mxu0 %v3072_v6 }
0x1097   : > { %3105 = vmatpush1.msra.mxu0 %v3071_v7 }
0x1098   : > { %3106 = vmatprep.subr.mxu0 %v3070_v8 }
0x1099   : > { %3107 = vmatpush1.msra.mxu0 %v3069_v9 }
0x109a   : > { %3108 = vmatprep.subr.mxu0 %v3068_v10 }
0x114e   : > { %v2954_v20 = vpop.f32.mrf.mxu0 }
0x114f   : > { %v3347_v21 = vmul.f32 -1.442695, %v2954_v20 }
0x1150   : > { %v2956_v26 = vpop.f32.mrf.mxu0 }
0x1151   : > { %3969 = vpow2.f32 %v3347_v21 }
0x115e   : > { %v3970_v22 = vpop.eup %3969 }
0x115f   : > { %v2962_v23 = vadd.f32 1.0, %v3970_v22 }
0x1161   : > { %3971 = vrcp.f32 %v2962_v23 }
0x116e   : > { %v3972_v24 = vpop.eup %3971 }
0x116f   : > { %v2965_v25 = vmul.f32 %v3972_v24, %v2954_v20 }
0x1171   : > { %v2966_v32 = vmul.f32 %v2965_v25, %v2956_v26 }
0x1173   : > { %3825 = vmatmul.mubr.f32.vlgmr.msra.gmra.mxu1 %v2966_v32 }
0x1233   : > { %v3050_v35 = vpop.f32.mrf.mxu1 }
0x1234   : > { %v3054_v36 = vadd.f32 %v3050_v35, %v4914_v11  ;;  %v3067_v11 = vld [vmem:[#allocation10 + $0x20] sm:$0xff] }
0x1235   : > { %v3826_v60 = vpop.f32.mrf.mxu1  ;;  %3109 = vmatpush1.msra.mxu0 %v3067_v11 }
0x1236   : > { %v3055_v61 = vmul.f32 %v3054_v36, %v3054_v36  ;;  %3110 = vmatprep.subr.mxu0 %v3066_v27 }
0x1237   : > { %3111 = vmatpush1.msra.mxu0 %v3065_v28 }
0x1238   : > { %v3056_v62 = vsel %vm424_vm0, %v3055_v61, 0.0  ;;  %3112 = vmatprep.subr.mxu0 %v3064_v29 }
0x1239   : > { %3057 = vadd.xlane.f32.xlu0 %v3056_v62  ;;  %3113 = vmatpush1.msra.mxu0 %v3063_v30 }
0x12c2   : > { %v3058_v31 = vpop.xlane.xlu0 %3057 }
0x12c3   : > { %v3059_v47 = vmul.f32 0.015625, %v3058_v31 }
0x12c5   : > { %v3060_v33 = vadd.f32 1e-05, %v3059_v47 }
0x12c7   : > { %3973 = vrsqrt.f32 %v3060_v33 }
0x12d4   : > { %v3974_v34 = vpop.eup %3973 }
0x12d5   : > { %v3062_v37 = vmul.f32 %v3974_v34, %v3054_v36 }
0x12d7   : > { %3364 = vmatmul.mubr.msk.f32.vlgmr.msra.gmra.mxu0 %vm424_vm0, %v3062_v37 }
0x1397   : > { %v3148_v38 = vpop.f32.mrf.mxu0 }
0x1398   : > { %3153 = vst [vmem:[%s403_s21] sm:$0xff] %v3148_v38 }
0x1399   : > { %v3150_v39 = vpop.f32.mrf.mxu0 }
0x139a   : > { %3154 = vst [vmem:[%s403_s21 + $0x8] sm:$0xff] %v3150_v39 }
0x139b   : > { %4120 = shalt.err (!%p4117_p11)
}
0x139c   : > { %s4121_s25 = scalar_lea.hbm %s3168_s14, 256  ;;  %s4125_s29 = scalar_lea.hbm %s5087_s9, 512 }
0x139d   : > { %p4122_p13 = scmp.ne.s32.totalorder %s3168_s14, %s4121_s25  ;;  %p4126_p4 = scmp.lt.s32.totalorder %s3168_s14, %s5087_s9 }
0x139e   : > { %p4127_p6 = scmp.lt.s32.totalorder %s4125_s29, %s4121_s25 }
0x139f   : > { %p4123_p1 = pnand %p4122_p13, %p5113_p7 }
0x13a0   : > { %p4128_p5 = por %p4127_p6, %p4126_p4 }
0x13a1   : > { %p4124_p3 = pneg %p4123_p1 }
0x13a3   : > { %p4129_p8 = pnand %p4128_p5, %p4124_p3 }
0x13a5   : > { %4132 = shalt.err (!%p4129_p8)
}
0x13a6   : > { %3845 = dma.vmem_to_hbm [thread:$0]  (%p5113_p7), %s5038_s5, 256, %s3168_s14, %s3156_s26  }
0x13a7 PF: > { %s3182_s21 = sand.u32 1, %s4167_s30   ;;  %p5114_p10 = scmp.ne.s32.totalorder %s5105_s20, 0 }
0x13a8   : > { %p5115_p0 = scmp.ge.s32.totalorder %s4179_s12, 2  ;;  %s3183_s2 = scalar_lea.sflag [#allocation4], %s3182_s21 }
0x13aa   : > { %p3865_p12 = pnand %p5115_p0, %p5114_p10 }
0x13ac   : > { %p3866_p2 = pneg %p3865_p12 }
0x13ae   : > { %4162 = dma.done.wait (%p3866_p2), %s3183_s2, 256  }
0x13af   : > { %4164 = vsyncadd (%p3866_p2), %s3183_s2, 4294967040  ;;  %p24_p9 = scmp.ge.s32.totalorder %s4337_s27, 4   ;;  %s5116_s30 = smov %s4171_s10 }
0x13b0   : > { %s5117_s10 = smov %s4175_s11  ;;  %s5118_s11 = smov %s4348_s13 }
0x13b1   : > { %s5119_s12 = smov %s4337_s27  ;;  %26 = sbr.rel (!%p24_p9) target bundleno = 12 (0xc), region = 121 }
0x13b6   :  { %3188 = vsyncpa [#allocation3], 1 }
0x13b7   :  { %3190 = vsyncpa [#allocation3 + $0x1], 1 }
0x13b8   :  { %3191 = vsyncpa [#allocation6], 1 }
0x13b9   :  { %3192 = vsyncpa [#allocation9], 1 }
0x13ba   :  { %3193 = vsyncpa [#allocation4], 1 }
0x13bb   :  { %3195 = vsyncpa [#allocation4 + $0x1], 1 }

</bundles_post_ra>
